<compile_context>
chip_gen: v6e
topology: v6e:2x2x1
jax: 0.10.0
libtpu: 0.0.40
codegen_flags: <defaults>
</compile_context>

<pallas_src>
import functools

import jax
import jax.numpy as jnp
from jax.experimental import pallas as pl
from jax.experimental.pallas import tpu as pltpu

NEG_SLOPE = 0.1   # nn.LeakyReLU(negative_slope=0.1)
EPS = 1e-5        # nn.GroupNorm default eps

# 3x3 tap offsets (dy, dx), row-major; column index of the (C, 9*Cin) weight
# matrix is tap*Cin + cin, matching the weight reshape in the wrapper.
_TAPS = tuple((oy, ox) for oy in (-1, 0, 1) for ox in (-1, 0, 1))


def _leaky(v):
    # leaky_relu with 0 < slope < 1  ==  max(v, slope*v)   (single VPU op)
    return jnp.maximum(v, NEG_SLOPE * v)


def residual_block_kernel(x_ref, w1_ref, b1_ref, g1_ref, be1_ref,
                          w2_ref, b2_ref, g2_ref, be2_ref,
                          avg_ref, mask_ref, out_ref,
                          patch_ref, y_ref, *, img_w, img_hw, nb):
    C, L = x_ref.shape            # (C, nb*HW)
    HW = img_hw

    w1 = w1_ref[...]              # (C, 9*C) bf16
    w2 = w2_ref[...]              # (C, 9*C) bf16
    b1, b2 = b1_ref[...], b2_ref[...]        # (C, 1) f32
    g1, g2 = g1_ref[...], g2_ref[...]        # (C, 1) f32
    be1, be2 = be1_ref[...], be2_ref[...]    # (C, 1) f32
    avg = avg_ref[...]            # (C, C) group-average matrix, 1/(cpg*HW)
    masks = mask_ref[...]         # (9, L) 0/1 same-padding border masks

    def build_patch(v):
        # v: (C, L) f32  ->  patch_ref: (9C, L) bf16 im2col slab.
        # Lane rolls act on the whole batched slab; values pulled across an
        # image boundary land exactly on masked (out-of-image) positions.
        for k, (oy, ox) in enumerate(_TAPS):
            if (oy, ox) == (0, 0):
                tap = v                                   # centre tap: no mask
            else:
                sh = (-(oy * img_w + ox)) % L
                tap = pltpu.roll(v, shift=sh, axis=1) * masks[k:k + 1, :]
            patch_ref[k * C:(k + 1) * C, :] = tap.astype(patch_ref.dtype)

    def conv(v, w, b):
        # One (C, 9C) @ (9C, nb*HW) bf16 MXU matmul, f32 accumulation.
        build_patch(v)
        return jnp.dot(w, patch_ref[...],
                       preferred_element_type=jnp.float32) + b    # (C, L) f32

    def gn_leaky_store(y, gamma, beta):
        # Per-image two-pass GroupNorm + leaky, written into y_ref.
        # Spatial lane-sums first, then the tiny (C,C)@(C,1) group average.
        for n in range(nb):
            lo, hi = n * HW, (n + 1) * HW                 # 128-aligned slices
            yn = y[:, lo:hi]
            mu = jnp.dot(avg, jnp.sum(yn, axis=1, keepdims=True),
                         preferred_element_type=jnp.float32)      # (C, 1)
            cen = yn - mu
            var = jnp.dot(avg, jnp.sum(cen * cen, axis=1, keepdims=True),
                          preferred_element_type=jnp.float32)     # (C, 1)
            yhat = cen * jax.lax.rsqrt(var + EPS) * gamma + beta
            y_ref[:, lo:hi] = _leaky(yhat)

    # conv1 -> GN -> leaky  (result lives in y_ref)
    gn_leaky_store(conv(x_ref[...], w1, b1), g1, be1)
    # conv2 -> GN -> leaky
    gn_leaky_store(conv(y_ref[...], w2, b2), g2, be2)
    # identity shortcut + final leaky relu; lane-dense store.
    out_ref[...] = _leaky(x_ref[...] + y_ref[...]).astype(out_ref.dtype)


def residual_block_pallas(x_nchw, params, num_groups, batch_tile=None):
    B, Cin, H, W = x_nchw.shape
    C = params["w1"].shape[-1]               # w1 is HWIO: (3, 3, Cin, C)
    assert Cin == C, "stride=1 identity shortcut requires in_planes == planes"
    assert C % num_groups == 0 and C % 8 == 0
    HW = H * W
    assert HW % 128 == 0, "kernel assumes lane-dense images (H*W % 128 == 0)"

    if batch_tile is None:
        # Guarantee >= 2 grid steps when B >= 2 (v7x second TensorCore +
        # BlockSpec pipelining), while still amortizing per-step overhead.
        cap = max(1, B // 2)
        batch_tile = next(nb for nb in (8, 4, 2, 1) if nb <= cap and B % nb == 0)
    assert B % batch_tile == 0
    nb = batch_tile
    L = nb * HW

    # Layout: channels on sublanes, batch*spatial on lanes.  One device-side
    # transpose each way; keeps every in-kernel op lane-dense and lets each
    # conv batch its N dimension over the whole batch tile.
    x_flat = jnp.transpose(x_nchw, (1, 0, 2, 3)).reshape(C, B * HW)
    x_flat = x_flat.astype(jnp.float32)

    # Weights as (Cout, 9*Cin) bf16 MXU operands (column order tap*Cin + cin,
    # matching the in-kernel im2col row order).  Scalars stay f32.
    w1 = params["w1"].reshape(9 * Cin, C).T.astype(jnp.bfloat16)
    w2 = params["w2"].reshape(9 * C, C).T.astype(jnp.bfloat16)
    b1 = params["b1"].reshape(C, 1).astype(jnp.float32)
    b2 = params["b2"].reshape(C, 1).astype(jnp.float32)
    g1 = params["g1"].reshape(C, 1).astype(jnp.float32)
    g2 = params["g2"].reshape(C, 1).astype(jnp.float32)
    be1 = params["be1"].reshape(C, 1).astype(jnp.float32)
    be2 = params["be2"].reshape(C, 1).astype(jnp.float32)

    # Group-average matrix: avg[c, j] = 1/(cpg*HW) iff group(c) == group(j)
    # (does the group sum AND the broadcast back to all channels in one op).
    cpg = C // num_groups
    gid = jnp.arange(C, dtype=jnp.int32) // cpg
    avg = (gid[:, None] == gid[None, :]).astype(jnp.float32) / float(cpg * HW)

    # Per-tap 0/1 border masks for the same-padding rolls, tiled along the
    # lane axis once per image of the batch tile.
    hh = jnp.arange(HW, dtype=jnp.int32) // W
    ww = jnp.arange(HW, dtype=jnp.int32) % W
    masks = jnp.stack(
        [((hh + oy >= 0) & (hh + oy < H) & (ww + ox >= 0) & (ww + ox < W))
         for (oy, ox) in _TAPS], axis=0).astype(jnp.float32)        # (9, HW)
    masks = jnp.tile(masks, (1, nb))                                # (9, L)

    kernel = functools.partial(residual_block_kernel,
                               img_w=W, img_hw=HW, nb=nb)

    def const_spec(shape):
        return pl.BlockSpec(shape, lambda b: (0, 0))

    # Explicit VMEM budget (v7x has 64 MiB physical VMEM): double-buffered
    # in/out blocks + im2col scratch + y scratch + constants, with margin.
    est = (2 * 2 * C * L * 4              # in + out blocks, double buffered
           + 9 * C * L * 2                # bf16 im2col scratch
           + C * L * 4                    # f32 GN/leaky scratch
           + 2 * (2 * C * 9 * C * 2 + C * C * 4 + 9 * L * 4 + 6 * C * 4)
           + 8 * C * L * 4)               # live f32 intermediates headroom
    vmem_limit = int(min(max(4 * est, 8 * 2**20), 48 * 2**20))

    out_flat = pl.pallas_call(
        kernel,
        out_shape=jax.ShapeDtypeStruct((C, B * HW), jnp.float32),
        grid_spec=pltpu.PrefetchScalarGridSpec(
            num_scalar_prefetch=0,
            grid=(B // nb,),
            in_specs=[
                pl.BlockSpec((C, L), lambda b: (0, b)),
                const_spec((C, 9 * Cin)),
                const_spec((C, 1)), const_spec((C, 1)), const_spec((C, 1)),
                const_spec((C, 9 * C)),
                const_spec((C, 1)), const_spec((C, 1)), const_spec((C, 1)),
                const_spec((C, C)),
                const_spec((9, L)),
            ],
            out_specs=pl.BlockSpec((C, L), lambda b: (0, b)),
            scratch_shapes=[
                pltpu.VMEM((9 * C, L), jnp.bfloat16),   # reused im2col patch
                pltpu.VMEM((C, L), jnp.float32),        # GN + leaky result
            ]),
        compiler_params=pltpu.CompilerParams(
            dimension_semantics=("parallel",),          # batch steps independent
            vmem_limit_bytes=vmem_limit),
    )(x_flat, w1, b1, g1, be1, w2, b2, g2, be2, avg, masks)

    return jnp.transpose(out_flat.reshape(C, B, H, W), (1, 0, 2, 3))


def residual_block_reference(x, params, num_groups, mxu_dtype=None):
    """Pure-JAX NCHW reference.  If mxu_dtype is set, conv operands are
    rounded to that dtype first (matches the kernel's bf16 MXU operands with
    f32 accumulation); otherwise full f32 module semantics."""
    def rnd(v):
        return v.astype(mxu_dtype).astype(jnp.float32) if mxu_dtype else v

    def conv(v, w, b):
        out = jax.lax.conv_general_dilated(
            rnd(v), rnd(w), window_strides=(1, 1), padding="SAME",
            dimension_numbers=("NCHW", "HWIO", "NCHW"),
            precision=jax.lax.Precision.HIGHEST)
        return out + b[None, :, None, None]

    def gn(v, gamma, beta):
        B, C, H, W = v.shape
        vg = v.reshape(B, num_groups, C // num_groups, H, W)
        mu = jnp.mean(vg, axis=(2, 3, 4), keepdims=True)
        var = jnp.mean((vg - mu) ** 2, axis=(2, 3, 4), keepdims=True)
        vn = ((vg - mu) / jnp.sqrt(var + EPS)).reshape(B, C, H, W)
        return vn * gamma[None, :, None, None] + beta[None, :, None, None]

    y = _leaky(gn(conv(x, params["w1"], params["b1"]),
                  params["g1"], params["be1"]))
    y = _leaky(gn(conv(y, params["w2"], params["b2"]),
                  params["g2"], params["be2"]))
    return _leaky(x + y)


if __name__ == "__main__":
    # ResidualBlock(in_planes=16, planes=16, norm_fn='group', stride=1)
    B, C, H, W = 4, 16, 16, 16
    num_groups = C // 8  # = 2, as in the module

    key = jax.random.PRNGKey(0)
    k = jax.random.split(key, 9)
    params = {
        # weights stored in HWIO layout (3, 3, Cin, Cout)
        "w1": 0.1 * jax.random.normal(k[0], (3, 3, C, C), jnp.float32),
        "b1": 0.1 * jax.random.normal(k[1], (C,), jnp.float32),
        "w2": 0.1 * jax.random.normal(k[2], (3, 3, C, C), jnp.float32),
        "b2": 0.1 * jax.random.normal(k[3], (C,), jnp.float32),
        "g1": 1.0 + 0.1 * jax.random.normal(k[4], (C,), jnp.float32),
        "be1": 0.1 * jax.random.normal(k[5], (C,), jnp.float32),
        "g2": 1.0 + 0.1 * jax.random.normal(k[6], (C,), jnp.float32),
        "be2": 0.1 * jax.random.normal(k[7], (C,), jnp.float32),
    }
    x = jax.random.normal(k[8], (B, C, H, W), jnp.float32)

    out = jax.block_until_ready(residual_block_pallas(x, params, num_groups))
    assert out.shape == (B, C, H, W)

    # Tight check vs a reference that rounds conv operands to bf16 exactly
    # like the kernel's MXU inputs (f32 accumulation in both).
    ref_bf16 = jax.block_until_ready(
        residual_block_reference(x, params, num_groups, mxu_dtype=jnp.bfloat16))
    err_b = jnp.max(jnp.abs(out - ref_bf16))
    assert jnp.allclose(out, ref_bf16, atol=5e-3, rtol=5e-3), (
        f"max abs err vs bf16-operand reference {err_b}")

    # Coarse sanity check vs the pure-f32 module semantics (tolerance reflects
    # the intentional bf16 MXU-operand precision choice).
    ref_f32 = jax.block_until_ready(
        residual_block_reference(x, params, num_groups, mxu_dtype=None))
    err_f = jnp.max(jnp.abs(out - ref_f32))
    assert jnp.allclose(out, ref_f32, atol=1e-1, rtol=1e-1), (
        f"max abs err vs f32 reference {err_f}")

    print("KERNEL_OK")
</pallas_src>

<mosaic_0001>
module attributes {stable_mosaic.version = 11 : i64} {
  func.func @residual_block_kernel(%arg0: i32, %arg1: memref<16x512xf32, #tpu.memory_space<vmem>>, %arg2: memref<16x144xbf16, #tpu.memory_space<vmem>>, %arg3: memref<16x1xf32, #tpu.memory_space<vmem>>, %arg4: memref<16x1xf32, #tpu.memory_space<vmem>>, %arg5: memref<16x1xf32, #tpu.memory_space<vmem>>, %arg6: memref<16x144xbf16, #tpu.memory_space<vmem>>, %arg7: memref<16x1xf32, #tpu.memory_space<vmem>>, %arg8: memref<16x1xf32, #tpu.memory_space<vmem>>, %arg9: memref<16x1xf32, #tpu.memory_space<vmem>>, %arg10: memref<16x16xf32, #tpu.memory_space<vmem>>, %arg11: memref<9x512xf32, #tpu.memory_space<vmem>>, %arg12: memref<16x512xf32, #tpu.memory_space<vmem>>, %arg13: memref<144x512xbf16, #tpu.memory_space<vmem>>, %arg14: memref<16x512xf32, #tpu.memory_space<vmem>>) attributes {dimension_semantics = [#tpu.dimension_semantics<parallel>], iteration_bounds = array<i64: 2>, scalar_prefetch = 0 : i64, scratch_operands = 2 : i64, tpu.core_type = #tpu.core_type<tc>, window_params = [{transform_indices = @transform_0, window_bounds = array<i64: 16, 512>}, {pipeline_mode = #tpu.pipeline_mode<synchronous>, transform_indices = @transform_1, window_bounds = array<i64: 16, 144>}, {pipeline_mode = #tpu.pipeline_mode<synchronous>, transform_indices = @transform_2, window_bounds = array<i64: 16, 1>}, {pipeline_mode = #tpu.pipeline_mode<synchronous>, transform_indices = @transform_3, window_bounds = array<i64: 16, 1>}, {pipeline_mode = #tpu.pipeline_mode<synchronous>, transform_indices = @transform_4, window_bounds = array<i64: 16, 1>}, {pipeline_mode = #tpu.pipeline_mode<synchronous>, transform_indices = @transform_5, window_bounds = array<i64: 16, 144>}, {pipeline_mode = #tpu.pipeline_mode<synchronous>, transform_indices = @transform_6, window_bounds = array<i64: 16, 1>}, {pipeline_mode = #tpu.pipeline_mode<synchronous>, transform_indices = @transform_7, window_bounds = array<i64: 16, 1>}, {pipeline_mode = #tpu.pipeline_mode<synchronous>, transform_indices = @transform_8, window_bounds = array<i64: 16, 1>}, {pipeline_mode = #tpu.pipeline_mode<synchronous>, transform_indices = @transform_9, window_bounds = array<i64: 16, 16>}, {pipeline_mode = #tpu.pipeline_mode<synchronous>, transform_indices = @transform_10, window_bounds = array<i64: 9, 512>}, {transform_indices = @transform_11, window_bounds = array<i64: 16, 512>}]} {
    %c0 = arith.constant 0 : index
    %c0_0 = arith.constant 0 : index
    %0 = vector.load %arg2[%c0, %c0_0] : memref<16x144xbf16, #tpu.memory_space<vmem>>, vector<16x144xbf16>
    %c0_1 = arith.constant 0 : index
    %c0_2 = arith.constant 0 : index
    %1 = vector.load %arg6[%c0_1, %c0_2] : memref<16x144xbf16, #tpu.memory_space<vmem>>, vector<16x144xbf16>
    %c0_3 = arith.constant 0 : index
    %c0_4 = arith.constant 0 : index
    %2 = vector.load %arg3[%c0_3, %c0_4] : memref<16x1xf32, #tpu.memory_space<vmem>>, vector<16x1xf32>
    %c0_5 = arith.constant 0 : index
    %c0_6 = arith.constant 0 : index
    %3 = vector.load %arg7[%c0_5, %c0_6] : memref<16x1xf32, #tpu.memory_space<vmem>>, vector<16x1xf32>
    %c0_7 = arith.constant 0 : index
    %c0_8 = arith.constant 0 : index
    %4 = vector.load %arg4[%c0_7, %c0_8] : memref<16x1xf32, #tpu.memory_space<vmem>>, vector<16x1xf32>
    %c0_9 = arith.constant 0 : index
    %c0_10 = arith.constant 0 : index
    %5 = vector.load %arg8[%c0_9, %c0_10] : memref<16x1xf32, #tpu.memory_space<vmem>>, vector<16x1xf32>
    %c0_11 = arith.constant 0 : index
    %c0_12 = arith.constant 0 : index
    %6 = vector.load %arg5[%c0_11, %c0_12] : memref<16x1xf32, #tpu.memory_space<vmem>>, vector<16x1xf32>
    %c0_13 = arith.constant 0 : index
    %c0_14 = arith.constant 0 : index
    %7 = vector.load %arg9[%c0_13, %c0_14] : memref<16x1xf32, #tpu.memory_space<vmem>>, vector<16x1xf32>
    %c0_15 = arith.constant 0 : index
    %c0_16 = arith.constant 0 : index
    %8 = vector.load %arg10[%c0_15, %c0_16] : memref<16x16xf32, #tpu.memory_space<vmem>>, vector<16x16xf32>
    %c0_17 = arith.constant 0 : index
    %c0_18 = arith.constant 0 : index
    %9 = vector.load %arg11[%c0_17, %c0_18] : memref<9x512xf32, #tpu.memory_space<vmem>>, vector<9x512xf32>
    %c0_19 = arith.constant 0 : index
    %c0_20 = arith.constant 0 : index
    %10 = vector.load %arg1[%c0_19, %c0_20] : memref<16x512xf32, #tpu.memory_space<vmem>>, vector<16x512xf32>
    %c17_i32 = arith.constant 17 : i32
    %11 = tpu.dynamic_rotate %10 by %c17_i32 dim 1 : vector<16x512xf32>, i32 -> vector<16x512xf32>
    %12 = vector.extract_strided_slice %9 {offsets = [0, 0], sizes = [1, 512], strides = [1, 1]} : vector<9x512xf32> to vector<1x512xf32>
    %13 = vector.broadcast %12 : vector<1x512xf32> to vector<16x512xf32>
    %14 = arith.mulf %11, %13 : vector<16x512xf32>
    %15 = arith.truncf %14 : vector<16x512xf32> to vector<16x512xbf16>
    %c0_21 = arith.constant 0 : index
    %c0_22 = arith.constant 0 : index
    %16 = vector.load %arg13[%c0_21, %c0_22] : memref<144x512xbf16, #tpu.memory_space<vmem>>, vector<16x512xbf16>
    tpu.vector_store %arg13[%c0_21, %c0_22], %15 {strides = array<i32>} : memref<144x512xbf16, #tpu.memory_space<vmem>>, vector<16x512xbf16>,
    %c16_i32 = arith.constant 16 : i32
    %17 = tpu.dynamic_rotate %10 by %c16_i32 dim 1 : vector<16x512xf32>, i32 -> vector<16x512xf32>
    %18 = vector.extract_strided_slice %9 {offsets = [1, 0], sizes = [1, 512], strides = [1, 1]} : vector<9x512xf32> to vector<1x512xf32>
    %19 = vector.broadcast %18 : vector<1x512xf32> to vector<16x512xf32>
    %20 = arith.mulf %17, %19 : vector<16x512xf32>
    %21 = arith.truncf %20 : vector<16x512xf32> to vector<16x512xbf16>
    %c16 = arith.constant 16 : index
    %c0_23 = arith.constant 0 : index
    %22 = vector.load %arg13[%c16, %c0_23] : memref<144x512xbf16, #tpu.memory_space<vmem>>, vector<16x512xbf16>
    tpu.vector_store %arg13[%c16, %c0_23], %21 {strides = array<i32>} : memref<144x512xbf16, #tpu.memory_space<vmem>>, vector<16x512xbf16>,
    %c15_i32 = arith.constant 15 : i32
    %23 = tpu.dynamic_rotate %10 by %c15_i32 dim 1 : vector<16x512xf32>, i32 -> vector<16x512xf32>
    %24 = vector.extract_strided_slice %9 {offsets = [2, 0], sizes = [1, 512], strides = [1, 1]} : vector<9x512xf32> to vector<1x512xf32>
    %25 = vector.broadcast %24 : vector<1x512xf32> to vector<16x512xf32>
    %26 = arith.mulf %23, %25 : vector<16x512xf32>
    %27 = arith.truncf %26 : vector<16x512xf32> to vector<16x512xbf16>
    %c32 = arith.constant 32 : index
    %c0_24 = arith.constant 0 : index
    %28 = vector.load %arg13[%c32, %c0_24] : memref<144x512xbf16, #tpu.memory_space<vmem>>, vector<16x512xbf16>
    tpu.vector_store %arg13[%c32, %c0_24], %27 {strides = array<i32>} : memref<144x512xbf16, #tpu.memory_space<vmem>>, vector<16x512xbf16>,
    %c1_i32 = arith.constant 1 : i32
    %29 = tpu.dynamic_rotate %10 by %c1_i32 dim 1 : vector<16x512xf32>, i32 -> vector<16x512xf32>
    %30 = vector.extract_strided_slice %9 {offsets = [3, 0], sizes = [1, 512], strides = [1, 1]} : vector<9x512xf32> to vector<1x512xf32>
    %31 = vector.broadcast %30 : vector<1x512xf32> to vector<16x512xf32>
    %32 = arith.mulf %29, %31 : vector<16x512xf32>
    %33 = arith.truncf %32 : vector<16x512xf32> to vector<16x512xbf16>
    %c48 = arith.constant 48 : index
    %c0_25 = arith.constant 0 : index
    %34 = vector.load %arg13[%c48, %c0_25] : memref<144x512xbf16, #tpu.memory_space<vmem>>, vector<16x512xbf16>
    tpu.vector_store %arg13[%c48, %c0_25], %33 {strides = array<i32>} : memref<144x512xbf16, #tpu.memory_space<vmem>>, vector<16x512xbf16>,
    %35 = arith.truncf %10 : vector<16x512xf32> to vector<16x512xbf16>
    %c64 = arith.constant 64 : index
    %c0_26 = arith.constant 0 : index
    %36 = vector.load %arg13[%c64, %c0_26] : memref<144x512xbf16, #tpu.memory_space<vmem>>, vector<16x512xbf16>
    tpu.vector_store %arg13[%c64, %c0_26], %35 {strides = array<i32>} : memref<144x512xbf16, #tpu.memory_space<vmem>>, vector<16x512xbf16>,
    %c511_i32 = arith.constant 511 : i32
    %37 = tpu.dynamic_rotate %10 by %c511_i32 dim 1 : vector<16x512xf32>, i32 -> vector<16x512xf32>
    %38 = vector.extract_strided_slice %9 {offsets = [5, 0], sizes = [1, 512], strides = [1, 1]} : vector<9x512xf32> to vector<1x512xf32>
    %39 = vector.broadcast %38 : vector<1x512xf32> to vector<16x512xf32>
    %40 = arith.mulf %37, %39 : vector<16x512xf32>
    %41 = arith.truncf %40 : vector<16x512xf32> to vector<16x512xbf16>
    %c80 = arith.constant 80 : index
    %c0_27 = arith.constant 0 : index
    %42 = vector.load %arg13[%c80, %c0_27] : memref<144x512xbf16, #tpu.memory_space<vmem>>, vector<16x512xbf16>
    tpu.vector_store %arg13[%c80, %c0_27], %41 {strides = array<i32>} : memref<144x512xbf16, #tpu.memory_space<vmem>>, vector<16x512xbf16>,
    %c497_i32 = arith.constant 497 : i32
    %43 = tpu.dynamic_rotate %10 by %c497_i32 dim 1 : vector<16x512xf32>, i32 -> vector<16x512xf32>
    %44 = vector.extract_strided_slice %9 {offsets = [6, 0], sizes = [1, 512], strides = [1, 1]} : vector<9x512xf32> to vector<1x512xf32>
    %45 = vector.broadcast %44 : vector<1x512xf32> to vector<16x512xf32>
    %46 = arith.mulf %43, %45 : vector<16x512xf32>
    %47 = arith.truncf %46 : vector<16x512xf32> to vector<16x512xbf16>
    %c96 = arith.constant 96 : index
    %c0_28 = arith.constant 0 : index
    %48 = vector.load %arg13[%c96, %c0_28] : memref<144x512xbf16, #tpu.memory_space<vmem>>, vector<16x512xbf16>
    tpu.vector_store %arg13[%c96, %c0_28], %47 {strides = array<i32>} : memref<144x512xbf16, #tpu.memory_space<vmem>>, vector<16x512xbf16>,
    %c496_i32 = arith.constant 496 : i32
    %49 = tpu.dynamic_rotate %10 by %c496_i32 dim 1 : vector<16x512xf32>, i32 -> vector<16x512xf32>
    %50 = vector.extract_strided_slice %9 {offsets = [7, 0], sizes = [1, 512], strides = [1, 1]} : vector<9x512xf32> to vector<1x512xf32>
    %51 = vector.broadcast %50 : vector<1x512xf32> to vector<16x512xf32>
    %52 = arith.mulf %49, %51 : vector<16x512xf32>
    %53 = arith.truncf %52 : vector<16x512xf32> to vector<16x512xbf16>
    %c112 = arith.constant 112 : index
    %c0_29 = arith.constant 0 : index
    %54 = vector.load %arg13[%c112, %c0_29] : memref<144x512xbf16, #tpu.memory_space<vmem>>, vector<16x512xbf16>
    tpu.vector_store %arg13[%c112, %c0_29], %53 {strides = array<i32>} : memref<144x512xbf16, #tpu.memory_space<vmem>>, vector<16x512xbf16>,
    %c495_i32 = arith.constant 495 : i32
    %55 = tpu.dynamic_rotate %10 by %c495_i32 dim 1 : vector<16x512xf32>, i32 -> vector<16x512xf32>
    %56 = vector.extract_strided_slice %9 {offsets = [8, 0], sizes = [1, 512], strides = [1, 1]} : vector<9x512xf32> to vector<1x512xf32>
    %57 = vector.broadcast %56 : vector<1x512xf32> to vector<16x512xf32>
    %58 = arith.mulf %55, %57 : vector<16x512xf32>
    %59 = arith.truncf %58 : vector<16x512xf32> to vector<16x512xbf16>
    %c128 = arith.constant 128 : index
    %c0_30 = arith.constant 0 : index
    %60 = vector.load %arg13[%c128, %c0_30] : memref<144x512xbf16, #tpu.memory_space<vmem>>, vector<16x512xbf16>
    tpu.vector_store %arg13[%c128, %c0_30], %59 {strides = array<i32>} : memref<144x512xbf16, #tpu.memory_space<vmem>>, vector<16x512xbf16>,
    %c0_31 = arith.constant 0 : index
    %c0_32 = arith.constant 0 : index
    %61 = vector.load %arg13[%c0_31, %c0_32] : memref<144x512xbf16, #tpu.memory_space<vmem>>, vector<144x512xbf16>
    %cst = arith.constant dense<0.000000e+00> : vector<16x512xf32>
    %62 = tpu.matmul %0, %61, %cst {dimension_numbers = #tpu.dot_dimension_numbers<[1], [0], [0], [1], [0, 0, 1, 1], [], []>} : vector<16x144xbf16>, vector<144x512xbf16>, vector<16x512xf32> -> vector<16x512xf32>
    %63 = vector.broadcast %2 : vector<16x1xf32> to vector<16x512xf32>
    %64 = arith.addf %62, %63 : vector<16x512xf32>
    %65 = vector.extract_strided_slice %64 {offsets = [0, 0], sizes = [16, 256], strides = [1, 1]} : vector<16x512xf32> to vector<16x256xf32>
    %cst_33 = arith.constant dense<0.000000e+00> : vector<16xf32>
    %66 = vector.multi_reduction <add>, %65, %cst_33 [1] : vector<16x256xf32> to vector<16xf32>
    %67 = vector.shape_cast %66 : vector<16xf32> to vector<16x1xf32>
    %cst_34 = arith.constant dense<0.000000e+00> : vector<16x1xf32>
    %68 = tpu.matmul %8, %67, %cst_34 {dimension_numbers = #tpu.dot_dimension_numbers<[1], [0], [0], [1], [0, 0, 1, 1], [], []>} : vector<16x16xf32>, vector<16x1xf32>, vector<16x1xf32> -> vector<16x1xf32>
    %69 = vector.broadcast %68 : vector<16x1xf32> to vector<16x256xf32>
    %70 = arith.subf %65, %69 : vector<16x256xf32>
    %71 = arith.mulf %70, %70 : vector<16x256xf32>
    %cst_35 = arith.constant dense<0.000000e+00> : vector<16xf32>
    %72 = vector.multi_reduction <add>, %71, %cst_35 [1] : vector<16x256xf32> to vector<16xf32>
    %73 = vector.shape_cast %72 : vector<16xf32> to vector<16x1xf32>
    %cst_36 = arith.constant dense<0.000000e+00> : vector<16x1xf32>
    %74 = tpu.matmul %8, %73, %cst_36 {dimension_numbers = #tpu.dot_dimension_numbers<[1], [0], [0], [1], [0, 0, 1, 1], [], []>} : vector<16x16xf32>, vector<16x1xf32>, vector<16x1xf32> -> vector<16x1xf32>
    %cst_37 = arith.constant 9.99999974E-6 : f32
    %75 = vector.broadcast %cst_37 : f32 to vector<16x1xf32>
    %76 = arith.addf %74, %75 : vector<16x1xf32>
    %77 = math.rsqrt %76 : vector<16x1xf32>
    %78 = vector.broadcast %77 : vector<16x1xf32> to vector<16x256xf32>
    %79 = arith.mulf %70, %78 : vector<16x256xf32>
    %80 = vector.broadcast %4 : vector<16x1xf32> to vector<16x256xf32>
    %81 = arith.mulf %79, %80 : vector<16x256xf32>
    %82 = vector.broadcast %6 : vector<16x1xf32> to vector<16x256xf32>
    %83 = arith.addf %81, %82 : vector<16x256xf32>
    %cst_38 = arith.constant 1.000000e-01 : f32
    %84 = vector.broadcast %cst_38 : f32 to vector<16x256xf32>
    %85 = arith.mulf %84, %83 : vector<16x256xf32>
    %86 = arith.maximumf %83, %85 : vector<16x256xf32>
    %c0_39 = arith.constant 0 : index
    %c0_40 = arith.constant 0 : index
    %87 = vector.load %arg14[%c0_39, %c0_40] : memref<16x512xf32, #tpu.memory_space<vmem>>, vector<16x256xf32>
    tpu.vector_store %arg14[%c0_39, %c0_40], %86 {strides = array<i32>} : memref<16x512xf32, #tpu.memory_space<vmem>>, vector<16x256xf32>,
    %88 = vector.extract_strided_slice %64 {offsets = [0, 256], sizes = [16, 256], strides = [1, 1]} : vector<16x512xf32> to vector<16x256xf32>
    %cst_41 = arith.constant dense<0.000000e+00> : vector<16xf32>
    %89 = vector.multi_reduction <add>, %88, %cst_41 [1] : vector<16x256xf32> to vector<16xf32>
    %90 = vector.shape_cast %89 : vector<16xf32> to vector<16x1xf32>
    %cst_42 = arith.constant dense<0.000000e+00> : vector<16x1xf32>
    %91 = tpu.matmul %8, %90, %cst_42 {dimension_numbers = #tpu.dot_dimension_numbers<[1], [0], [0], [1], [0, 0, 1, 1], [], []>} : vector<16x16xf32>, vector<16x1xf32>, vector<16x1xf32> -> vector<16x1xf32>
    %92 = vector.broadcast %91 : vector<16x1xf32> to vector<16x256xf32>
    %93 = arith.subf %88, %92 : vector<16x256xf32>
    %94 = arith.mulf %93, %93 : vector<16x256xf32>
    %cst_43 = arith.constant dense<0.000000e+00> : vector<16xf32>
    %95 = vector.multi_reduction <add>, %94, %cst_43 [1] : vector<16x256xf32> to vector<16xf32>
    %96 = vector.shape_cast %95 : vector<16xf32> to vector<16x1xf32>
    %cst_44 = arith.constant dense<0.000000e+00> : vector<16x1xf32>
    %97 = tpu.matmul %8, %96, %cst_44 {dimension_numbers = #tpu.dot_dimension_numbers<[1], [0], [0], [1], [0, 0, 1, 1], [], []>} : vector<16x16xf32>, vector<16x1xf32>, vector<16x1xf32> -> vector<16x1xf32>
    %cst_45 = arith.constant 9.99999974E-6 : f32
    %98 = vector.broadcast %cst_45 : f32 to vector<16x1xf32>
    %99 = arith.addf %97, %98 : vector<16x1xf32>
    %100 = math.rsqrt %99 : vector<16x1xf32>
    %101 = vector.broadcast %100 : vector<16x1xf32> to vector<16x256xf32>
    %102 = arith.mulf %93, %101 : vector<16x256xf32>
    %103 = vector.broadcast %4 : vector<16x1xf32> to vector<16x256xf32>
    %104 = arith.mulf %102, %103 : vector<16x256xf32>
    %105 = vector.broadcast %6 : vector<16x1xf32> to vector<16x256xf32>
    %106 = arith.addf %104, %105 : vector<16x256xf32>
    %cst_46 = arith.constant 1.000000e-01 : f32
    %107 = vector.broadcast %cst_46 : f32 to vector<16x256xf32>
    %108 = arith.mulf %107, %106 : vector<16x256xf32>
    %109 = arith.maximumf %106, %108 : vector<16x256xf32>
    %c0_47 = arith.constant 0 : index
    %c256 = arith.constant 256 : index
    %110 = vector.load %arg14[%c0_47, %c256] : memref<16x512xf32, #tpu.memory_space<vmem>>, vector<16x256xf32>
    tpu.vector_store %arg14[%c0_47, %c256], %109 {strides = array<i32>} : memref<16x512xf32, #tpu.memory_space<vmem>>, vector<16x256xf32>,
    %c0_48 = arith.constant 0 : index
    %c0_49 = arith.constant 0 : index
    %111 = vector.load %arg14[%c0_48, %c0_49] : memref<16x512xf32, #tpu.memory_space<vmem>>, vector<16x512xf32>
    %c17_i32_50 = arith.constant 17 : i32
    %112 = tpu.dynamic_rotate %111 by %c17_i32_50 dim 1 : vector<16x512xf32>, i32 -> vector<16x512xf32>
    %113 = vector.extract_strided_slice %9 {offsets = [0, 0], sizes = [1, 512], strides = [1, 1]} : vector<9x512xf32> to vector<1x512xf32>
    %114 = vector.broadcast %113 : vector<1x512xf32> to vector<16x512xf32>
    %115 = arith.mulf %112, %114 : vector<16x512xf32>
    %116 = arith.truncf %115 : vector<16x512xf32> to vector<16x512xbf16>
    %c0_51 = arith.constant 0 : index
    %c0_52 = arith.constant 0 : index
    %117 = vector.load %arg13[%c0_51, %c0_52] : memref<144x512xbf16, #tpu.memory_space<vmem>>, vector<16x512xbf16>
    tpu.vector_store %arg13[%c0_51, %c0_52], %116 {strides = array<i32>} : memref<144x512xbf16, #tpu.memory_space<vmem>>, vector<16x512xbf16>,
    %c16_i32_53 = arith.constant 16 : i32
    %118 = tpu.dynamic_rotate %111 by %c16_i32_53 dim 1 : vector<16x512xf32>, i32 -> vector<16x512xf32>
    %119 = vector.extract_strided_slice %9 {offsets = [1, 0], sizes = [1, 512], strides = [1, 1]} : vector<9x512xf32> to vector<1x512xf32>
    %120 = vector.broadcast %119 : vector<1x512xf32> to vector<16x512xf32>
    %121 = arith.mulf %118, %120 : vector<16x512xf32>
    %122 = arith.truncf %121 : vector<16x512xf32> to vector<16x512xbf16>
    %c16_54 = arith.constant 16 : index
    %c0_55 = arith.constant 0 : index
    %123 = vector.load %arg13[%c16_54, %c0_55] : memref<144x512xbf16, #tpu.memory_space<vmem>>, vector<16x512xbf16>
    tpu.vector_store %arg13[%c16_54, %c0_55], %122 {strides = array<i32>} : memref<144x512xbf16, #tpu.memory_space<vmem>>, vector<16x512xbf16>,
    %c15_i32_56 = arith.constant 15 : i32
    %124 = tpu.dynamic_rotate %111 by %c15_i32_56 dim 1 : vector<16x512xf32>, i32 -> vector<16x512xf32>
    %125 = vector.extract_strided_slice %9 {offsets = [2, 0], sizes = [1, 512], strides = [1, 1]} : vector<9x512xf32> to vector<1x512xf32>
    %126 = vector.broadcast %125 : vector<1x512xf32> to vector<16x512xf32>
    %127 = arith.mulf %124, %126 : vector<16x512xf32>
    %128 = arith.truncf %127 : vector<16x512xf32> to vector<16x512xbf16>
    %c32_57 = arith.constant 32 : index
    %c0_58 = arith.constant 0 : index
    %129 = vector.load %arg13[%c32_57, %c0_58] : memref<144x512xbf16, #tpu.memory_space<vmem>>, vector<16x512xbf16>
    tpu.vector_store %arg13[%c32_57, %c0_58], %128 {strides = array<i32>} : memref<144x512xbf16, #tpu.memory_space<vmem>>, vector<16x512xbf16>,
    %c1_i32_59 = arith.constant 1 : i32
    %130 = tpu.dynamic_rotate %111 by %c1_i32_59 dim 1 : vector<16x512xf32>, i32 -> vector<16x512xf32>
    %131 = vector.extract_strided_slice %9 {offsets = [3, 0], sizes = [1, 512], strides = [1, 1]} : vector<9x512xf32> to vector<1x512xf32>
    %132 = vector.broadcast %131 : vector<1x512xf32> to vector<16x512xf32>
    %133 = arith.mulf %130, %132 : vector<16x512xf32>
    %134 = arith.truncf %133 : vector<16x512xf32> to vector<16x512xbf16>
    %c48_60 = arith.constant 48 : index
    %c0_61 = arith.constant 0 : index
    %135 = vector.load %arg13[%c48_60, %c0_61] : memref<144x512xbf16, #tpu.memory_space<vmem>>, vector<16x512xbf16>
    tpu.vector_store %arg13[%c48_60, %c0_61], %134 {strides = array<i32>} : memref<144x512xbf16, #tpu.memory_space<vmem>>, vector<16x512xbf16>,
    %136 = arith.truncf %111 : vector<16x512xf32> to vector<16x512xbf16>
    %c64_62 = arith.constant 64 : index
    %c0_63 = arith.constant 0 : index
    %137 = vector.load %arg13[%c64_62, %c0_63] : memref<144x512xbf16, #tpu.memory_space<vmem>>, vector<16x512xbf16>
    tpu.vector_store %arg13[%c64_62, %c0_63], %136 {strides = array<i32>} : memref<144x512xbf16, #tpu.memory_space<vmem>>, vector<16x512xbf16>,
    %c511_i32_64 = arith.constant 511 : i32
    %138 = tpu.dynamic_rotate %111 by %c511_i32_64 dim 1 : vector<16x512xf32>, i32 -> vector<16x512xf32>
    %139 = vector.extract_strided_slice %9 {offsets = [5, 0], sizes = [1, 512], strides = [1, 1]} : vector<9x512xf32> to vector<1x512xf32>
    %140 = vector.broadcast %139 : vector<1x512xf32> to vector<16x512xf32>
    %141 = arith.mulf %138, %140 : vector<16x512xf32>
    %142 = arith.truncf %141 : vector<16x512xf32> to vector<16x512xbf16>
    %c80_65 = arith.constant 80 : index
    %c0_66 = arith.constant 0 : index
    %143 = vector.load %arg13[%c80_65, %c0_66] : memref<144x512xbf16, #tpu.memory_space<vmem>>, vector<16x512xbf16>
    tpu.vector_store %arg13[%c80_65, %c0_66], %142 {strides = array<i32>} : memref<144x512xbf16, #tpu.memory_space<vmem>>, vector<16x512xbf16>,
    %c497_i32_67 = arith.constant 497 : i32
    %144 = tpu.dynamic_rotate %111 by %c497_i32_67 dim 1 : vector<16x512xf32>, i32 -> vector<16x512xf32>
    %145 = vector.extract_strided_slice %9 {offsets = [6, 0], sizes = [1, 512], strides = [1, 1]} : vector<9x512xf32> to vector<1x512xf32>
    %146 = vector.broadcast %145 : vector<1x512xf32> to vector<16x512xf32>
    %147 = arith.mulf %144, %146 : vector<16x512xf32>
    %148 = arith.truncf %147 : vector<16x512xf32> to vector<16x512xbf16>
    %c96_68 = arith.constant 96 : index
    %c0_69 = arith.constant 0 : index
    %149 = vector.load %arg13[%c96_68, %c0_69] : memref<144x512xbf16, #tpu.memory_space<vmem>>, vector<16x512xbf16>
    tpu.vector_store %arg13[%c96_68, %c0_69], %148 {strides = array<i32>} : memref<144x512xbf16, #tpu.memory_space<vmem>>, vector<16x512xbf16>,
    %c496_i32_70 = arith.constant 496 : i32
    %150 = tpu.dynamic_rotate %111 by %c496_i32_70 dim 1 : vector<16x512xf32>, i32 -> vector<16x512xf32>
    %151 = vector.extract_strided_slice %9 {offsets = [7, 0], sizes = [1, 512], strides = [1, 1]} : vector<9x512xf32> to vector<1x512xf32>
    %152 = vector.broadcast %151 : vector<1x512xf32> to vector<16x512xf32>
    %153 = arith.mulf %150, %152 : vector<16x512xf32>
    %154 = arith.truncf %153 : vector<16x512xf32> to vector<16x512xbf16>
    %c112_71 = arith.constant 112 : index
    %c0_72 = arith.constant 0 : index
    %155 = vector.load %arg13[%c112_71, %c0_72] : memref<144x512xbf16, #tpu.memory_space<vmem>>, vector<16x512xbf16>
    tpu.vector_store %arg13[%c112_71, %c0_72], %154 {strides = array<i32>} : memref<144x512xbf16, #tpu.memory_space<vmem>>, vector<16x512xbf16>,
    %c495_i32_73 = arith.constant 495 : i32
    %156 = tpu.dynamic_rotate %111 by %c495_i32_73 dim 1 : vector<16x512xf32>, i32 -> vector<16x512xf32>
    %157 = vector.extract_strided_slice %9 {offsets = [8, 0], sizes = [1, 512], strides = [1, 1]} : vector<9x512xf32> to vector<1x512xf32>
    %158 = vector.broadcast %157 : vector<1x512xf32> to vector<16x512xf32>
    %159 = arith.mulf %156, %158 : vector<16x512xf32>
    %160 = arith.truncf %159 : vector<16x512xf32> to vector<16x512xbf16>
    %c128_74 = arith.constant 128 : index
    %c0_75 = arith.constant 0 : index
    %161 = vector.load %arg13[%c128_74, %c0_75] : memref<144x512xbf16, #tpu.memory_space<vmem>>, vector<16x512xbf16>
    tpu.vector_store %arg13[%c128_74, %c0_75], %160 {strides = array<i32>} : memref<144x512xbf16, #tpu.memory_space<vmem>>, vector<16x512xbf16>,
    %c0_76 = arith.constant 0 : index
    %c0_77 = arith.constant 0 : index
    %162 = vector.load %arg13[%c0_76, %c0_77] : memref<144x512xbf16, #tpu.memory_space<vmem>>, vector<144x512xbf16>
    %cst_78 = arith.constant dense<0.000000e+00> : vector<16x512xf32>
    %163 = tpu.matmul %1, %162, %cst_78 {dimension_numbers = #tpu.dot_dimension_numbers<[1], [0], [0], [1], [0, 0, 1, 1], [], []>} : vector<16x144xbf16>, vector<144x512xbf16>, vector<16x512xf32> -> vector<16x512xf32>
    %164 = vector.broadcast %3 : vector<16x1xf32> to vector<16x512xf32>
    %165 = arith.addf %163, %164 : vector<16x512xf32>
    %166 = vector.extract_strided_slice %165 {offsets = [0, 0], sizes = [16, 256], strides = [1, 1]} : vector<16x512xf32> to vector<16x256xf32>
    %cst_79 = arith.constant dense<0.000000e+00> : vector<16xf32>
    %167 = vector.multi_reduction <add>, %166, %cst_79 [1] : vector<16x256xf32> to vector<16xf32>
    %168 = vector.shape_cast %167 : vector<16xf32> to vector<16x1xf32>
    %cst_80 = arith.constant dense<0.000000e+00> : vector<16x1xf32>
    %169 = tpu.matmul %8, %168, %cst_80 {dimension_numbers = #tpu.dot_dimension_numbers<[1], [0], [0], [1], [0, 0, 1, 1], [], []>} : vector<16x16xf32>, vector<16x1xf32>, vector<16x1xf32> -> vector<16x1xf32>
    %170 = vector.broadcast %169 : vector<16x1xf32> to vector<16x256xf32>
    %171 = arith.subf %166, %170 : vector<16x256xf32>
    %172 = arith.mulf %171, %171 : vector<16x256xf32>
    %cst_81 = arith.constant dense<0.000000e+00> : vector<16xf32>
    %173 = vector.multi_reduction <add>, %172, %cst_81 [1] : vector<16x256xf32> to vector<16xf32>
    %174 = vector.shape_cast %173 : vector<16xf32> to vector<16x1xf32>
    %cst_82 = arith.constant dense<0.000000e+00> : vector<16x1xf32>
    %175 = tpu.matmul %8, %174, %cst_82 {dimension_numbers = #tpu.dot_dimension_numbers<[1], [0], [0], [1], [0, 0, 1, 1], [], []>} : vector<16x16xf32>, vector<16x1xf32>, vector<16x1xf32> -> vector<16x1xf32>
    %cst_83 = arith.constant 9.99999974E-6 : f32
    %176 = vector.broadcast %cst_83 : f32 to vector<16x1xf32>
    %177 = arith.addf %175, %176 : vector<16x1xf32>
    %178 = math.rsqrt %177 : vector<16x1xf32>
    %179 = vector.broadcast %178 : vector<16x1xf32> to vector<16x256xf32>
    %180 = arith.mulf %171, %179 : vector<16x256xf32>
    %181 = vector.broadcast %5 : vector<16x1xf32> to vector<16x256xf32>
    %182 = arith.mulf %180, %181 : vector<16x256xf32>
    %183 = vector.broadcast %7 : vector<16x1xf32> to vector<16x256xf32>
    %184 = arith.addf %182, %183 : vector<16x256xf32>
    %cst_84 = arith.constant 1.000000e-01 : f32
    %185 = vector.broadcast %cst_84 : f32 to vector<16x256xf32>
    %186 = arith.mulf %185, %184 : vector<16x256xf32>
    %187 = arith.maximumf %184, %186 : vector<16x256xf32>
    %c0_85 = arith.constant 0 : index
    %c0_86 = arith.constant 0 : index
    %188 = vector.load %arg14[%c0_85, %c0_86] : memref<16x512xf32, #tpu.memory_space<vmem>>, vector<16x256xf32>
    tpu.vector_store %arg14[%c0_85, %c0_86], %187 {strides = array<i32>} : memref<16x512xf32, #tpu.memory_space<vmem>>, vector<16x256xf32>,
    %189 = vector.extract_strided_slice %165 {offsets = [0, 256], sizes = [16, 256], strides = [1, 1]} : vector<16x512xf32> to vector<16x256xf32>
    %cst_87 = arith.constant dense<0.000000e+00> : vector<16xf32>
    %190 = vector.multi_reduction <add>, %189, %cst_87 [1] : vector<16x256xf32> to vector<16xf32>
    %191 = vector.shape_cast %190 : vector<16xf32> to vector<16x1xf32>
    %cst_88 = arith.constant dense<0.000000e+00> : vector<16x1xf32>
    %192 = tpu.matmul %8, %191, %cst_88 {dimension_numbers = #tpu.dot_dimension_numbers<[1], [0], [0], [1], [0, 0, 1, 1], [], []>} : vector<16x16xf32>, vector<16x1xf32>, vector<16x1xf32> -> vector<16x1xf32>
    %193 = vector.broadcast %192 : vector<16x1xf32> to vector<16x256xf32>
    %194 = arith.subf %189, %193 : vector<16x256xf32>
    %195 = arith.mulf %194, %194 : vector<16x256xf32>
    %cst_89 = arith.constant dense<0.000000e+00> : vector<16xf32>
    %196 = vector.multi_reduction <add>, %195, %cst_89 [1] : vector<16x256xf32> to vector<16xf32>
    %197 = vector.shape_cast %196 : vector<16xf32> to vector<16x1xf32>
    %cst_90 = arith.constant dense<0.000000e+00> : vector<16x1xf32>
    %198 = tpu.matmul %8, %197, %cst_90 {dimension_numbers = #tpu.dot_dimension_numbers<[1], [0], [0], [1], [0, 0, 1, 1], [], []>} : vector<16x16xf32>, vector<16x1xf32>, vector<16x1xf32> -> vector<16x1xf32>
    %cst_91 = arith.constant 9.99999974E-6 : f32
    %199 = vector.broadcast %cst_91 : f32 to vector<16x1xf32>
    %200 = arith.addf %198, %199 : vector<16x1xf32>
    %201 = math.rsqrt %200 : vector<16x1xf32>
    %202 = vector.broadcast %201 : vector<16x1xf32> to vector<16x256xf32>
    %203 = arith.mulf %194, %202 : vector<16x256xf32>
    %204 = vector.broadcast %5 : vector<16x1xf32> to vector<16x256xf32>
    %205 = arith.mulf %203, %204 : vector<16x256xf32>
    %206 = vector.broadcast %7 : vector<16x1xf32> to vector<16x256xf32>
    %207 = arith.addf %205, %206 : vector<16x256xf32>
    %cst_92 = arith.constant 1.000000e-01 : f32
    %208 = vector.broadcast %cst_92 : f32 to vector<16x256xf32>
    %209 = arith.mulf %208, %207 : vector<16x256xf32>
    %210 = arith.maximumf %207, %209 : vector<16x256xf32>
    %c0_93 = arith.constant 0 : index
    %c256_94 = arith.constant 256 : index
    %211 = vector.load %arg14[%c0_93, %c256_94] : memref<16x512xf32, #tpu.memory_space<vmem>>, vector<16x256xf32>
    tpu.vector_store %arg14[%c0_93, %c256_94], %210 {strides = array<i32>} : memref<16x512xf32, #tpu.memory_space<vmem>>, vector<16x256xf32>,
    %c0_95 = arith.constant 0 : index
    %c0_96 = arith.constant 0 : index
    %212 = vector.load %arg1[%c0_95, %c0_96] : memref<16x512xf32, #tpu.memory_space<vmem>>, vector<16x512xf32>
    %c0_97 = arith.constant 0 : index
    %c0_98 = arith.constant 0 : index
    %213 = vector.load %arg14[%c0_97, %c0_98] : memref<16x512xf32, #tpu.memory_space<vmem>>, vector<16x512xf32>
    %214 = arith.addf %212, %213 : vector<16x512xf32>
    %cst_99 = arith.constant 1.000000e-01 : f32
    %215 = vector.broadcast %cst_99 : f32 to vector<16x512xf32>
    %216 = arith.mulf %215, %214 : vector<16x512xf32>
    %217 = arith.maximumf %214, %216 : vector<16x512xf32>
    %c0_100 = arith.constant 0 : index
    %c0_101 = arith.constant 0 : index
    %218 = vector.load %arg12[%c0_100, %c0_101] : memref<16x512xf32, #tpu.memory_space<vmem>>, vector<16x512xf32>
    tpu.vector_store %arg12[%c0_100, %c0_101], %217 {strides = array<i32>} : memref<16x512xf32, #tpu.memory_space<vmem>>, vector<16x512xf32>,
    return
  }
  func.func @transform_0(%arg0: i32) -> (i32, i32) {
    %c0_i32 = arith.constant 0 : i32
    %c0_i32_0 = arith.constant 0 : i32
    return %c0_i32, %arg0 : i32, i32
  }
  func.func @transform_1(%arg0: i32) -> (i32, i32) {
    %c0_i32 = arith.constant 0 : i32
    %c0_i32_0 = arith.constant 0 : i32
    %c0_i32_1 = arith.constant 0 : i32
    return %c0_i32, %c0_i32_0 : i32, i32
  }
  func.func @transform_2(%arg0: i32) -> (i32, i32) {
    %c0_i32 = arith.constant 0 : i32
    %c0_i32_0 = arith.constant 0 : i32
    %c0_i32_1 = arith.constant 0 : i32
    return %c0_i32, %c0_i32_0 : i32, i32
  }
  func.func @transform_3(%arg0: i32) -> (i32, i32) {
    %c0_i32 = arith.constant 0 : i32
    %c0_i32_0 = arith.constant 0 : i32
    %c0_i32_1 = arith.constant 0 : i32
    return %c0_i32, %c0_i32_0 : i32, i32
  }
  func.func @transform_4(%arg0: i32) -> (i32, i32) {
    %c0_i32 = arith.constant 0 : i32
    %c0_i32_0 = arith.constant 0 : i32
    %c0_i32_1 = arith.constant 0 : i32
    return %c0_i32, %c0_i32_0 : i32, i32
  }
  func.func @transform_5(%arg0: i32) -> (i32, i32) {
    %c0_i32 = arith.constant 0 : i32
    %c0_i32_0 = arith.constant 0 : i32
    %c0_i32_1 = arith.constant 0 : i32
    return %c0_i32, %c0_i32_0 : i32, i32
  }
  func.func @transform_6(%arg0: i32) -> (i32, i32) {
    %c0_i32 = arith.constant 0 : i32
    %c0_i32_0 = arith.constant 0 : i32
    %c0_i32_1 = arith.constant 0 : i32
    return %c0_i32, %c0_i32_0 : i32, i32
  }
  func.func @transform_7(%arg0: i32) -> (i32, i32) {
    %c0_i32 = arith.constant 0 : i32
    %c0_i32_0 = arith.constant 0 : i32
    %c0_i32_1 = arith.constant 0 : i32
    return %c0_i32, %c0_i32_0 : i32, i32
  }
  func.func @transform_8(%arg0: i32) -> (i32, i32) {
    %c0_i32 = arith.constant 0 : i32
    %c0_i32_0 = arith.constant 0 : i32
    %c0_i32_1 = arith.constant 0 : i32
    return %c0_i32, %c0_i32_0 : i32, i32
  }
  func.func @transform_9(%arg0: i32) -> (i32, i32) {
    %c0_i32 = arith.constant 0 : i32
    %c0_i32_0 = arith.constant 0 : i32
    %c0_i32_1 = arith.constant 0 : i32
    return %c0_i32, %c0_i32_0 : i32, i32
  }
  func.func @transform_10(%arg0: i32) -> (i32, i32) {
    %c0_i32 = arith.constant 0 : i32
    %c0_i32_0 = arith.constant 0 : i32
    %c0_i32_1 = arith.constant 0 : i32
    return %c0_i32, %c0_i32_0 : i32, i32
  }
  func.func @transform_11(%arg0: i32) -> (i32, i32) {
    %c0_i32 = arith.constant 0 : i32
    %c0_i32_0 = arith.constant 0 : i32
    return %c0_i32, %arg0 : i32, i32
  }
}

</mosaic_0001>

<bundles_post_ra>
// kernel: tpu_custom_call.1
= control target key start
LH: loop header
LB: loop body
LE: loop exit
PB: predicated region body
PF: predicated region fallthrough
CT: control target
= control target key end

     0   :  { %16 = vsyncpa [#allocation5], 0  ;;  %s5316_s0 = inlined_call_operand.hbm [shape: f32[16,1024], index: 0, kind: input, shape index: {}]   ;;  %s5317_s1 = inlined_call_operand.vmem [shape: bf16[16,144], index: 1, kind: input, shape index: {}]   ;;  %s5318_s2 = inlined_call_operand.vmem [shape: f32[16,1], index: 2, kind: input, shape index: {}]   ;;  %s5319_s3 = inlined_call_operand.vmem [shape: f32[16,1], index: 3, kind: input, shape index: {}]   ;;  %s5320_s4 = inlined_call_operand.vmem [shape: f32[16,1], index: 4, kind: input, shape index: {}]   ;;  %s5321_s5 = inlined_call_operand.vmem [shape: bf16[16,144], index: 5, kind: input, shape index: {}]   ;;  %s5322_s6 = inlined_call_operand.vmem [shape: f32[16,1], index: 6, kind: input, shape index: {}]   ;;  %s5323_s7 = inlined_call_operand.vmem [shape: f32[16,1], index: 7, kind: input, shape index: {}]   ;;  %s5324_s8 = inlined_call_operand.vmem [shape: f32[16,1], index: 8, kind: input, shape index: {}]   ;;  %s5325_s9 = inlined_call_operand.vmem [shape: f32[16,16], index: 9, kind: input, shape index: {}]   ;;  %s5326_s10 = inlined_call_operand.vmem [shape: f32[9,512], index: 10, kind: input, shape index: {}]   ;;  %s5327_s11 = inlined_call_operand.hbm [shape: f32[16,1024], index: 11, kind: output, shape index: {}]  }
   0x1   :  { %18 = vsyncpa [#allocation5 + $0x1], 0 }
   0x2   :  { %19 = vsyncpa [#allocation6], 0 }
   0x3   :  { %21 = vsyncpa [#allocation6 + $0x1], 0  ;;  %s3979_s17 = smov 0   ;;  %s3981_s18 = smov 0  }
   0x4   :  { %s3983_s19 = smov 0   ;;  %s3985_s20 = smov 0  }
   0x5 LB: > { %5377 = sst [smem:[#allocation10_spill]] %s3896_s19  ;;  %s4000_s21 = sadd.s32 4294967295, %s3900_s20   ;;  %s3900_s20 = sphi %s3985_s20, %s5444_s20   ;;  %s3896_s19 = sphi %s3983_s19, %s5446_s19   ;;  %s3892_s18 = sphi %s3981_s18, %s5448_s18   ;;  %s3888_s17 = sphi %s3979_s17, %s5447_s17  }
   0x6   : > { %s3298_s22 = sadd.s32 4294967294, %s3900_s20   ;;  %s4004_s23 = sadd.s32 1, %s3900_s20  }
   0x7   : > { %5378 = sst [smem:[#allocation11_spill]] %s4004_s23  ;;  %s34_s24 = sadd.s32 1, %s3896_s19 }
   0x8   : > { %s31_s25 = ssub.s32 %s3900_s20, %s4004_s23  ;;  %p41_p0 = scmp.ne.s32.totalorder %s3896_s19, %s3892_s18 }
   0x9   : > { %p32_p1 = scmp.eq.s32.totalorder %s31_s25, 0  ;;  %p42_p2 = scmp.eq.s32.totalorder %s3900_s20, 0 }
   0xa   : > { %p47_p3 = scmp.ne.s32.totalorder %s3892_s18, %s3888_s17  ;;  %p48_p4 = scmp.eq.s32.totalorder %s4000_s21, 0 }
   0xb   : > { %s4016_s26 = scalar_select %p32_p1, %s3896_s19, %s34_s24  }
   0xc   : > { %p4018_p5 = por %p42_p2, %p41_p0  ;;  %p4022_p6 = por %p48_p4, %p47_p3 }
   0xd   : > { %5379 = sst [smem:[#allocation12_spill]] %s4016_s26  ;;  %p281_p7 = scmp.eq.s32.totalorder %s4000_s21, 1 }
   0xe   : > { %s5381_s28 = scalar_select %p4022_p6, 1, 0 }
   0xf   : > { %p287_p8 = scmp.eq.s32.totalorder %s3298_s22, 1  ;;  %p3730_p10 = scmp.lt.s32.totalorder %s3900_s20, 2 }
  0x10   : > { %p4029_p11 = por %p281_p7, %p41_p0  ;;  %s337_s12 = sand.u32 1, %s3896_s19  }
  0x11   : > { %p4033_p12 = por %p287_p8, %p47_p3  ;;  %s3484_s13 = sshll.u32 %s3900_s20, 9 }
  0x12   : > { %s5382_s29 = scalar_select %p4029_p11, 1, 0 }
  0x13   : > { %s5383_s30 = scalar_select %p4033_p12, 1, 0 }
  0x14   : > { %s3301_s14 = sshll.u32 %s337_s12, 6  ;;  %s4042_s24 = scalar_lea.hbm %s5316_s0, %s3484_s13 }
  0x15   : > { %5384 = sst [smem:[#allocation13_spill]] %s5383_s30  ;;  %s341_s22 = scalar_lea.vmem [#allocation4], %s3301_s14 }
  0x16   : > { %s348_s25 = sshll.u32 %s341_s22, 4  ;;  %p4046_p13 = pnand %p3730_p10, %p4018_p5  ;;  %s4050_s25 = int_to_ptr.vmem [resolvable:$true] %s348_s25 }
  0x17   : > { %s4053_s19 = scalar_lea.sflag [#allocation5], %s337_s12  ;;  %s3808_s23 = scalar_lea.hbm %s4042_s24, 1024 }
  0x18   : > { %p3809_p1 = scmp.ne.s32.totalorder %s4042_s24, %s3808_s23  ;;  %p3810_p2 = pneg %p4046_p13 }
  0x19   : > { %s3813_s27 = scalar_lea.hbm %s5316_s0, 2048  ;;  %p3814_p5 = scmp.lt.s32.totalorder %s4042_s24, %s5316_s0 }
  0x1a   : > { %p3811_p3 = pnand %p3810_p2, %p3809_p1  ;;  %p3815_p7 = scmp.lt.s32.totalorder %s3813_s27, %s3808_s23 }
  0x1c   : > { %p3812_p4 = pneg %p3811_p3  ;;  %p3816_p8 = por %p3815_p7, %p3814_p5 }
  0x1e   : > { %p3817_p10 = pnand %p3816_p8, %p3812_p4 }
  0x20   : > { %3820 = shalt.err (!%p3817_p10)
}
  0x21   : > { %s3821_s12 = scalar_lea.vmem %s4050_s25, 1024  ;;  %s3902_s22 = smov [#allocation4]  }
  0x22   : > { %p3822_p9 = scmp.ne.s32.totalorder %s4050_s25, %s3821_s12  ;;  %s3826_s30 = sshll.u32 %s3902_s22, 4  ;;  %s3827_s30 = int_to_ptr.vmem [resolvable:$false] %s3826_s30 }
  0x23   : > { %s3828_s13 = scalar_lea.vmem %s3827_s30, 2048  ;;  %p3829_p3 = scmp.lt.s32.totalorder %s4050_s25, %s3827_s30 }
  0x24   : > { %p3824_p0 = pnand %p3822_p9, %p3810_p2  ;;  %p3830_p12 = scmp.lt.s32.totalorder %s3828_s13, %s3821_s12 }
  0x26   : > { %p3825_p1 = pneg %p3824_p0  ;;  %p3831_p11 = por %p3830_p12, %p3829_p3 }
  0x28   : > { %p3832_p6 = pnand %p3831_p11, %p3825_p1 }
  0x2a   : > { %3835 = shalt.err (!%p3832_p6)
}
  0x2b   : > { %s3903_s23 = smov 1024   ;;  %s3904_s14 = smov 512  }
  0x2c   : > { %s3905_s27 = smov 32   ;;  %p356_p9 = scmp.lt.s32.totalorder %s3900_s20, 3 }
  0x2d   : > { %3725 = dma.hbm_to_vmem [thread:$0]  (!%p4046_p13), %s4042_s24, 1024, %s4050_s25, %s4053_s19, %s3903_s23, %s3904_s14, %s3905_s27  }
  0x2e   : > { %p5386_p0 = scmp.ge.s32.totalorder %s3900_s20, 1 }
  0x30   : > { %p357_p2 = pnand %p5386_p0, %p356_p9 }
  0x32   : > { %360 = sbr.rel (%p357_p2) target bundleno = 2886 (0xb46), region = 64 }
  0x37   : > { %s4078_s30 = sand.u32 1, %s3892_s18   ;;  %p5387_p6 = scmp.ne.s32.totalorder %s5381_s28, 0 }
  0x38   : > { %s5334_s15 = sshll.u32 %s4078_s30, 6  ;;  %s363_s16 = scalar_lea.sflag [#allocation5], %s4078_s30 }
  0x39   : > { %s4084_s12 = scalar_lea.vmem [#allocation4], %s5334_s15 }
  0x3a   : > { %3879 = dma.done.wait (%p5387_p6), %s363_s16, 1024  }
  0x3b   : > { %3881 = vsyncadd (%p5387_p6), %s363_s16, 4294966272  ;;  %v4091_v0 = vld [vmem:[%s4084_s12 + $0x10] sm:$0xff]  ;;  %v4094_v1 = vld [vmem:[%s4084_s12 + $0x8] sm:$0xff]  ;;  %s3906_s19 = smov 112   ;;  %s3907_s26 = smov 113   ;;  %v458_v8 = vlaneseq  ;;  %vm1323_vm0 = vcmask 130048  }
  0x3c   : > { %942 = vrot.lane.b32.xlu1 %v4091_v0, %s3906_s19  ;;  %938 = vrot.lane.b32.xlu0 %v4094_v1, %s3906_s19  ;;  %v4101_v2 = vld [vmem:[%s4084_s12 + $0x30] sm:$0xff]  ;;  %v4104_v3 = vld [vmem:[%s4084_s12 + $0x28] sm:$0xff]  ;;  %s3908_s28 = smov 127   ;;  %s3909_s24 = smov 1   ;;  %v3914_v25 = vmov 0  }
  0x3d   : > { %v4111_v4 = vld [vmem:[%s4084_s12 + $0x20] sm:$0xff]  ;;  %v4129_v6 = vld [vmem:[%s4084_s12 + $0x38] sm:$0xff]  ;;  %s5341_s25 = smov 15   ;;  %s5339_s22 = smov 16   ;;  %v4226_v9 = vshrl.u32 %v458_v8, 7  ;;  %v4228_v10 = vand.u32 127, %v458_v8  ;;  %3780 = vset.pattern.permute.xlu1 %v3914_v25  ;;  %3779 = vset.pattern.permute.xlu0 %v3914_v25 }
  0x3e   : > { %v4114_v5 = vld [vmem:[%s4084_s12] sm:$0xff]  ;;  %v4132_v7 = vld [vmem:[%s4084_s12 + $0x18] sm:$0xff]  ;;  %s5337_s13 = smov 17   ;;  %s5335_s23 = smov 111   ;;  %v4241_v13 = vld [vmem:[%s5326_s10 + $0x8] sm:$0xff] }
  0x3f   : > { %v961_v11 = vsub.s32 7, %v4226_v9  ;;  %v3783_v12 = vld [vmem:[%s5317_s1 + $0x4] ss:$8 sps:$4 sm:$0xff]   ;;  %vm950_vm1 = vcmp.lt.s32.totalorder %v4228_v10, 112  ;;  %v884_v33 = vsub.s32 6, %v4226_v9  ;;  %vm873_vm2 = vcmp.lt.s32.totalorder %v4228_v10, 113 }
  0x40   : > { %944 = vrot.lane.b32.xlu1 %v4101_v2, %s3906_s19  ;;  %940 = vrot.lane.b32.xlu0 %v4104_v3, %s3906_s19  ;;  %v4258_v18 = vld [vmem:[%s5326_s10] sm:$0xff]  ;;  %v413_v38 = vld [vmem:[%s5318_s2 + $0x8] sm:$0xff]  ;;  %vm796_vm3 = vcmp.lt.s32.totalorder %v4228_v10, 127  ;;  %vm691_vm4 = vcmp.lt.s32.totalorder %v4228_v10, 1  ;;  %vm614_vm5 = vcmp.lt.s32.totalorder %v4228_v10, 15  ;;  %vm537_vm6 = vcmp.lt.s32.totalorder %v4228_v10, 16 }
  0x41   : > { %3385 = vmatprep.mubr.msk.bf16.mxu0 %vm1323_vm0, %v3783_v12  ;;  %3386 = vmatprep.mubr.msk.bf16.mxu1 %vm1323_vm0, %v3783_v12  ;;  %v4251_v16 = vrot.slane %v4241_v13, %v961_v11  ;;  %v4269_v24 = vrot.slane %v4258_v18, %v961_v11  ;;  %v412_v34 = vld [vmem:[%s5318_s2] sm:$0xff]  ;;  %v4290_v39 = vrot.slane %v4241_v13, %v884_v33  ;;  %v4295_v40 = vld [vmem:[%s5326_s10 + $0x18] sm:$0xff]  ;;  %v4300_v41 = vld [vmem:[%s5326_s10 + $0x10] sm:$0xff]  ;;  %vm460_vm7 = vcmp.lt.s32.totalorder %v4228_v10, 17  ;;  %s5402_s15 = smov 17   ;;  %s5403_s14 = smov 111  }
  0x42   : > { %v4309_v48 = vrot.slane %v4295_v40, %v961_v11  ;;  %v4312_v49 = vrot.slane %v4300_v41, %v961_v11  ;;  %v4315_v53 = vrot.slane %v4258_v18, %v884_v33  ;;  %vm1027_vm8 = vcmp.lt.s32.totalorder %v4228_v10, 111  ;;  %s3557_s27 = sshll.u32 %s4000_s21, 9  ;;  %s3212_s21 = scalar_lea.sflag [#allocation6], %s4078_s30 }
  0x43   : > { %p5440_p12 = scmp.ne.s32.totalorder %s5382_s29, 0 }
  0x44   : > { %936 = vrot.lane.b32.xlu1 %v4111_v4, %s3906_s19  ;;  %934 = vrot.lane.b32.xlu0 %v4114_v5, %s3906_s19 }
  0x48   : > { %863 = vrot.lane.b32.xlu1 %v4104_v3, %s3907_s26  ;;  %861 = vrot.lane.b32.xlu0 %v4094_v1, %s3907_s26 }
  0x4c   : > { %867 = vrot.lane.b32.xlu1 %v4101_v2, %s3907_s26  ;;  %865 = vrot.lane.b32.xlu0 %v4091_v0, %s3907_s26 }
  0x50   : > { %948 = vrot.lane.b32.xlu1 %v4129_v6, %s3906_s19  ;;  %946 = vrot.lane.b32.xlu0 %v4132_v7, %s3906_s19 }
  0x54   : > { %859 = vrot.lane.b32.xlu1 %v4111_v4, %s3907_s26  ;;  %857 = vrot.lane.b32.xlu0 %v4114_v5, %s3907_s26 }
  0x58   : > { %786 = vrot.lane.b32.xlu1 %v4104_v3, %s3908_s28  ;;  %784 = vrot.lane.b32.xlu0 %v4094_v1, %s3908_s28 }
  0x5c   : > { %790 = vrot.lane.b32.xlu1 %v4101_v2, %s3908_s28  ;;  %788 = vrot.lane.b32.xlu0 %v4091_v0, %s3908_s28 }
  0x60   : > { %871 = vrot.lane.b32.xlu1 %v4129_v6, %s3907_s26  ;;  %869 = vrot.lane.b32.xlu0 %v4132_v7, %s3907_s26 }
  0x64   : > { %782 = vrot.lane.b32.xlu1 %v4111_v4, %s3908_s28  ;;  %780 = vrot.lane.b32.xlu0 %v4114_v5, %s3908_s28 }
  0x68   : > { %794 = vrot.lane.b32.xlu1 %v4129_v6, %s3908_s28  ;;  %792 = vrot.lane.b32.xlu0 %v4132_v7, %s3908_s28 }
  0x6c   : > { %677 = vrot.lane.b32.xlu1 %v4111_v4, %s3909_s24  ;;  %675 = vrot.lane.b32.xlu0 %v4114_v5, %s3909_s24 }
  0x70   : > { %681 = vrot.lane.b32.xlu1 %v4104_v3, %s3909_s24  ;;  %679 = vrot.lane.b32.xlu0 %v4094_v1, %s3909_s24 }
  0x74   : > { %689 = vrot.lane.b32.xlu1 %v4129_v6, %s3909_s24  ;;  %687 = vrot.lane.b32.xlu0 %v4132_v7, %s3909_s24 }
  0x78   : > { %600 = vrot.lane.b32.xlu1 %v4111_v4, %s5341_s25  ;;  %598 = vrot.lane.b32.xlu0 %v4114_v5, %s5341_s25 }
  0x7c   : > { %604 = vrot.lane.b32.xlu1 %v4104_v3, %s5341_s25  ;;  %602 = vrot.lane.b32.xlu0 %v4094_v1, %s5341_s25 }
  0x80   : > { %685 = vrot.lane.b32.xlu1 %v4101_v2, %s3909_s24  ;;  %683 = vrot.lane.b32.xlu0 %v4091_v0, %s3909_s24 }
  0x84   : > { %612 = vrot.lane.b32.xlu1 %v4129_v6, %s5341_s25  ;;  %610 = vrot.lane.b32.xlu0 %v4132_v7, %s5341_s25 }
  0x88   : > { %523 = vrot.lane.b32.xlu1 %v4111_v4, %s5339_s22  ;;  %521 = vrot.lane.b32.xlu0 %v4114_v5, %s5339_s22 }
  0x8c   : > { %527 = vrot.lane.b32.xlu1 %v4104_v3, %s5339_s22  ;;  %525 = vrot.lane.b32.xlu0 %v4094_v1, %s5339_s22 }
  0x90   : > { %608 = vrot.lane.b32.xlu1 %v4101_v2, %s5341_s25  ;;  %606 = vrot.lane.b32.xlu0 %v4091_v0, %s5341_s25  ;;  %s5400_s25 = smov 15  }
  0x94   : > { %535 = vrot.lane.b32.xlu1 %v4129_v6, %s5339_s22  ;;  %533 = vrot.lane.b32.xlu0 %v4132_v7, %s5339_s22 }
  0x98   : > { %444 = vrot.lane.b32.xlu1 %v4111_v4, %s5337_s13  ;;  %442 = vrot.lane.b32.xlu0 %v4114_v5, %s5337_s13 }
  0x9c   : > { %448 = vrot.lane.b32.xlu1 %v4104_v3, %s5337_s13  ;;  %446 = vrot.lane.b32.xlu0 %v4094_v1, %s5337_s13 }
  0xa0   : > { %531 = vrot.lane.b32.xlu1 %v4101_v2, %s5339_s22  ;;  %529 = vrot.lane.b32.xlu0 %v4091_v0, %s5339_s22  ;;  %s5401_s22 = smov 16  }
  0xa4   : > { %456 = vrot.lane.b32.xlu1 %v4129_v6, %s5337_s13  ;;  %454 = vrot.lane.b32.xlu0 %v4132_v7, %s5337_s13 }
  0xa8   : > { %452 = vrot.lane.b32.xlu1 %v4101_v2, %s5337_s13  ;;  %450 = vrot.lane.b32.xlu0 %v4091_v0, %s5337_s13 }
  0xac   : > { %1017 = vrot.lane.b32.xlu1 %v4104_v3, %s5335_s23  ;;  %1015 = vrot.lane.b32.xlu0 %v4094_v1, %s5335_s23 }
  0xae   : > { %v943_v14 = vpop.permute.xlu1 %942  ;;  %v939_v15 = vpop.permute.xlu0 %938 }
  0xaf   : > { %v953_v17 = vsel %vm950_vm1, %v939_v15, %v943_v14 }
  0xb0   : > { %1021 = vrot.lane.b32.xlu1 %v4101_v2, %s5335_s23  ;;  %1019 = vrot.lane.b32.xlu0 %v4091_v0, %s5335_s23  ;;  %v976_v22 = vmul.f32 %v4251_v16, %v953_v17 }
  0xb2   : > { %v945_v19 = vpop.permute.xlu1 %944  ;;  %v941_v20 = vpop.permute.xlu0 %940 }
  0xb3   : > { %v954_v21 = vsel %vm950_vm1, %v941_v20, %v945_v19 }
  0xb4   : > { %1013 = vrot.lane.b32.xlu1 %v4111_v4, %s5335_s23  ;;  %1011 = vrot.lane.b32.xlu0 %v4114_v5, %s5335_s23  ;;  %v980_v23 = vmul.f32 %v4251_v16, %v954_v21 }
  0xb6   : > { %v937_v26 = vpop.permute.xlu1 %936  ;;  %v935_v27 = vpop.permute.xlu0 %934  ;;  %v3587_v28 = vpack.c.bf16 %v980_v23, %v976_v22 }
  0xb7   : > { %v956_v29 = vsel %vm950_vm1, %v937_v26, %v941_v20  ;;  %v955_v30 = vsel %vm950_vm1, %v935_v27, %v939_v15 }
  0xb8   : > { %1025 = vrot.lane.b32.xlu1 %v4129_v6, %s5335_s23  ;;  %1023 = vrot.lane.b32.xlu0 %v4132_v7, %s5335_s23  ;;  %v975_v31 = vmul.f32 %v4269_v24, %v955_v30  ;;  %v979_v32 = vmul.f32 %v4269_v24, %v956_v29  ;;  %s5271_s23 = scalar_lea.hbm %s5327_s11, %s3557_s27 }
  0xb9   : > { %1327 = vmatprep.subr.bf16.mxu0 %v3587_v28 }
  0xba   : > { %v864_v35 = vpop.permute.xlu1 %863  ;;  %v862_v36 = vpop.permute.xlu0 %861  ;;  %v3586_v37 = vpack.c.bf16 %v979_v32, %v975_v31  ;;  %v4347_v31 = vrot.slane %v4300_v41, %v884_v33  ;;  %v4350_v32 = vrot.slane %v4295_v40, %v884_v33 }
  0xbc   : > { %1328 = vmatpush1.bf16.msra.mxu0 %v3586_v37  ;;  %1126 = vperm.xlu1 %3780, %v412_v34  }
  0xbd   : > { %1131 = vperm.xlu0 %3779, %v413_v38  }
  0xbe   : > { %v868_v42 = vpop.permute.xlu1 %867  ;;  %v866_v43 = vpop.permute.xlu0 %865 }
  0xbf   : > { %v877_v44 = vsel %vm873_vm2, %v864_v35, %v868_v42  ;;  %v876_v45 = vsel %vm873_vm2, %v862_v36, %v866_v43 }
  0xc0   : > { %v903_v46 = vmul.f32 %v4290_v39, %v877_v44  ;;  %v899_v47 = vmul.f32 %v4290_v39, %v876_v45 }
  0xc2   : > { %v949_v50 = vpop.permute.xlu1 %948  ;;  %v947_v51 = vpop.permute.xlu0 %946  ;;  %v3583_v52 = vpack.c.bf16 %v903_v46, %v899_v47 }
  0xc3   : > { %v952_v54 = vsel %vm950_vm1, %v945_v19, %v949_v50  ;;  %v951_v55 = vsel %vm950_vm1, %v943_v14, %v947_v51  ;;  %v957_v56 = vsel %vm950_vm1, %v947_v51, %v935_v27  ;;  %v958_v57 = vsel %vm950_vm1, %v949_v50, %v937_v26 }
  0xc4   : > { %1329 = vmatprep.subr.bf16.mxu0 %v3583_v52  ;;  %v978_v58 = vmul.f32 %v4309_v48, %v957_v56  ;;  %v982_v59 = vmul.f32 %v4309_v48, %v958_v57  ;;  %v977_v60 = vmul.f32 %v4312_v49, %v951_v55  ;;  %v981_v61 = vmul.f32 %v4312_v49, %v952_v54 }
  0xc5   : > { %v807_v19 = vsub.s32 5, %v4226_v9 }
  0xc6   : > { %v860_v62 = vpop.permute.xlu1 %859  ;;  %v858_v63 = vpop.permute.xlu0 %857  ;;  %v3589_v8 = vpack.c.bf16 %v982_v59, %v978_v58  ;;  %v3588_v11 = vpack.c.bf16 %v981_v61, %v977_v60  ;;  %v3575_v61 = vpack.c.bf16 %v4104_v3, %v4094_v1 }
  0xc7   : > { %v879_v12 = vsel %vm873_vm2, %v860_v62, %v864_v35  ;;  %v878_v14 = vsel %vm873_vm2, %v858_v63, %v862_v36  ;;  %v4338_v23 = vrot.slane %v4241_v13, %v807_v19  ;;  %v4353_v37 = vrot.slane %v4258_v18, %v807_v19 }
  0xc8   : > { %v902_v15 = vmul.f32 %v4315_v53, %v879_v12  ;;  %v898_v17 = vmul.f32 %v4315_v53, %v878_v14  ;;  %1370 = vmatprep.subr.bf16.mxu1 %v3589_v8  ;;  %v4374_v59 = vrot.slane %v4300_v41, %v807_v19  ;;  %v4377_v60 = vrot.slane %v4295_v40, %v807_v19 }
  0xc9   : > { %1371 = vmatpush1.bf16.msra.mxu1 %v3588_v11  ;;  %v702_v11 = vsub.s32 3, %v4226_v9  ;;  %v3574_v12 = vpack.c.bf16 %v4111_v4, %v4114_v5 }
  0xca   : > { %v787_v20 = vpop.permute.xlu1 %786  ;;  %v785_v21 = vpop.permute.xlu0 %784  ;;  %v3582_v22 = vpack.c.bf16 %v902_v15, %v898_v17 }
  0xcc   : > { %1330 = vmatpush1.bf16.msra.mxu0 %v3582_v22 }
  0xce   : > { %v791_v25 = vpop.permute.xlu1 %790  ;;  %v789_v26 = vpop.permute.xlu0 %788 }
  0xcf   : > { %v800_v27 = vsel %vm796_vm3, %v787_v20, %v791_v25  ;;  %v799_v28 = vsel %vm796_vm3, %v785_v21, %v789_v26 }
  0xd0   : > { %v826_v29 = vmul.f32 %v4338_v23, %v800_v27  ;;  %v822_v30 = vmul.f32 %v4338_v23, %v799_v28  ;;  %v4400_v27 = vrot.slane %v4241_v13, %v702_v11  ;;  %v3576_v28 = vpack.c.bf16 %v4101_v2, %v4091_v0 }
  0xd2   : > { %v872_v34 = vpop.permute.xlu1 %871  ;;  %v870_v35 = vpop.permute.xlu0 %869  ;;  %v3579_v36 = vpack.c.bf16 %v826_v29, %v822_v30 }
  0xd3   : > { %v875_v38 = vsel %vm873_vm2, %v868_v42, %v872_v34  ;;  %v881_v44 = vsel %vm873_vm2, %v872_v34, %v860_v62  ;;  %v874_v45 = vsel %vm873_vm2, %v866_v43, %v870_v35  ;;  %v880_v46 = vsel %vm873_vm2, %v870_v35, %v858_v63 }
  0xd4   : > { %v904_v33 = vmul.f32 %v4347_v31, %v875_v38  ;;  %v905_v47 = vmul.f32 %v4350_v32, %v881_v44  ;;  %v900_v50 = vmul.f32 %v4347_v31, %v874_v45  ;;  %v901_v51 = vmul.f32 %v4350_v32, %v880_v46  ;;  %1331 = vmatprep.subr.bf16.mxu0 %v3579_v36 }
  0xd5   : > { %v4411_v36 = vrot.slane %v4258_v18, %v702_v11 }
  0xd6   : > { %v783_v52 = vpop.permute.xlu1 %782  ;;  %v781_v42 = vpop.permute.xlu0 %780  ;;  %v3585_v54 = vpack.c.bf16 %v905_v47, %v901_v51  ;;  %v3584_v55 = vpack.c.bf16 %v904_v33, %v900_v50  ;;  %v625_v47 = vsub.s32 2, %v4226_v9 }
  0xd7   : > { %v802_v56 = vsel %vm796_vm3, %v783_v52, %v787_v20  ;;  %v801_v43 = vsel %vm796_vm3, %v781_v42, %v785_v21 }
  0xd8   : > { %v825_v57 = vmul.f32 %v4353_v37, %v802_v56  ;;  %v821_v58 = vmul.f32 %v4353_v37, %v801_v43  ;;  %1372 = vmatprep.subr.bf16.mxu1 %v3585_v54 }
  0xd9   : > { %1373 = vmatpush1.bf16.msra.mxu1 %v3584_v55 }
  0xda   : > { %v795_v62 = vpop.permute.xlu1 %794  ;;  %v793_v63 = vpop.permute.xlu0 %792  ;;  %v3578_v8 = vpack.c.bf16 %v825_v57, %v821_v58 }
  0xdb   : > { %v798_v14 = vsel %vm796_vm3, %v791_v25, %v795_v62  ;;  %v804_v15 = vsel %vm796_vm3, %v795_v62, %v783_v52  ;;  %v797_v17 = vsel %vm796_vm3, %v789_v26, %v793_v63  ;;  %v803_v1 = vsel %vm796_vm3, %v793_v63, %v781_v42 }
  0xdc   : > { %v827_v3 = vmul.f32 %v4374_v59, %v798_v14  ;;  %v828_v19 = vmul.f32 %v4377_v60, %v804_v15  ;;  %v823_v20 = vmul.f32 %v4374_v59, %v797_v17  ;;  %v824_v4 = vmul.f32 %v4377_v60, %v803_v1  ;;  %1332 = vmatpush1.bf16.msra.mxu0 %v3578_v8 }
  0xdd   : > { %1333 = vmatprep.subr.bf16.mxu0 %v3575_v61  ;;  %v3577_v26 = vpack.c.bf16 %v4129_v6, %v4132_v7  ;;  %v4422_v42 = vrot.slane %v4241_v13, %v625_v47  ;;  %v4431_v61 = vrot.slane %v4300_v41, %v702_v11  ;;  %v4434_v62 = vrot.slane %v4295_v40, %v702_v11 }
  0xde   : > { %v678_v5 = vpop.permute.xlu1 %677  ;;  %v676_v21 = vpop.permute.xlu0 %675  ;;  %v3581_v22 = vpack.c.bf16 %v828_v19, %v824_v4  ;;  %v3580_v25 = vpack.c.bf16 %v827_v3, %v823_v20  ;;  %v4437_v14 = vrot.slane %v4258_v18, %v625_v47 }
  0xe0   : > { %1374 = vmatprep.subr.bf16.mxu1 %v3581_v22  ;;  %1334 = vmatpush1.bf16.msra.mxu0 %v3574_v12  ;;  %5388 = vst [vmem:[#allocation14_spill] sm:$0xff] %v4437_v14 }
  0xe1   : > { %1375 = vmatpush1.bf16.msra.mxu1 %v3580_v25 }
  0xe2   : > { %v682_v29 = vpop.permute.xlu1 %681  ;;  %v680_v30 = vpop.permute.xlu0 %679  ;;  %1376 = vmatprep.subr.bf16.mxu1 %v3577_v26 }
  0xe3   : > { %v697_v34 = vsel %vm691_vm4, %v678_v5, %v682_v29  ;;  %v696_v6 = vsel %vm691_vm4, %v676_v21, %v680_v30 }
  0xe4   : > { %v721_v7 = vmul.f32 %v4400_v27, %v697_v34  ;;  %v717_v35 = vmul.f32 %v4400_v27, %v696_v6  ;;  %v548_v34 = vsub.s32 1, %v4226_v9 }
  0xe5   : > { %1377 = vmatpush1.bf16.msra.mxu1 %v3576_v28 }
  0xe6   : > { %v690_v38 = vpop.permute.xlu1 %689  ;;  %v688_v44 = vpop.permute.xlu0 %687  ;;  %v3571_v0 = vpack.c.bf16 %v721_v7, %v717_v35 }
  0xe7   : > { %v699_v2 = vsel %vm691_vm4, %v690_v38, %v678_v5  ;;  %v698_v45 = vsel %vm691_vm4, %v688_v44, %v676_v21 }
  0xe8   : > { %v720_v46 = vmul.f32 %v4411_v36, %v699_v2  ;;  %v716_v33 = vmul.f32 %v4411_v36, %v698_v45  ;;  %1335 = vmatprep.subr.bf16.mxu0 %v3571_v0 }
  0xea   : > { %v601_v50 = vpop.permute.xlu1 %600  ;;  %v599_v51 = vpop.permute.xlu0 %598  ;;  %v3570_v52 = vpack.c.bf16 %v720_v46, %v716_v33 }
  0xec   : > { %1336 = vmatpush1.bf16.msra.mxu0 %v3570_v52 }
  0xee   : > { %v605_v54 = vpop.permute.xlu1 %604  ;;  %v603_v55 = vpop.permute.xlu0 %602 }
  0xef   : > { %v620_v56 = vsel %vm614_vm5, %v601_v50, %v605_v54  ;;  %v619_v43 = vsel %vm614_vm5, %v599_v51, %v603_v55 }
  0xf0   : > { %v644_v57 = vmul.f32 %v4422_v42, %v620_v56  ;;  %v640_v58 = vmul.f32 %v4422_v42, %v619_v43 }
  0xf2   : > { %v686_v63 = vpop.permute.xlu1 %685  ;;  %v684_v8 = vpop.permute.xlu0 %683  ;;  %v3567_v12 = vpack.c.bf16 %v644_v57, %v640_v58  ;;  %v4475_v57 = vrot.slane %v4258_v18, %v548_v34 }
  0xf3   : > { %v693_v15 = vsel %vm691_vm4, %v686_v63, %v690_v38  ;;  %v695_v17 = vsel %vm691_vm4, %v682_v29, %v686_v63  ;;  %v692_v1 = vsel %vm691_vm4, %v684_v8, %v688_v44  ;;  %v694_v3 = vsel %vm691_vm4, %v680_v30, %v684_v8 }
  0xf4   : > { %v722_v11 = vmul.f32 %v4431_v61, %v695_v17  ;;  %v723_v19 = vmul.f32 %v4434_v62, %v693_v15  ;;  %v718_v20 = vmul.f32 %v4431_v61, %v694_v3  ;;  %v719_v4 = vmul.f32 %v4434_v62, %v692_v1  ;;  %1337 = vmatprep.subr.bf16.mxu0 %v3567_v12 }
  0xf5   : > { %v4460_v38 = vrot.slane %v4241_v13, %v548_v34  ;;  %5392 = vst [vmem:[#allocation18_spill] sm:$0xff] %v4475_v57 }
  0xf6   : > { %v613_v5 = vpop.permute.xlu1 %612  ;;  %v611_v21 = vpop.permute.xlu0 %610  ;;  %v3573_v22 = vpack.c.bf16 %v723_v19, %v719_v4  ;;  %v3572_v25 = vpack.c.bf16 %v722_v11, %v718_v20 }
  0xf7   : > { %v622_v26 = vsel %vm614_vm5, %v613_v5, %v601_v50  ;;  %v621_v28 = vsel %vm614_vm5, %v611_v21, %v599_v51  ;;  %5389 = vst [vmem:[#allocation15_spill] sm:$0xff] %v4460_v38  ;;  %v4469_v50 = vrot.slane %v4300_v41, %v625_v47  ;;  %v4472_v51 = vrot.slane %v4295_v40, %v625_v47 }
  0xf8   : > { %v643_v29 = vmul.f32 %v4437_v14, %v622_v26  ;;  %v639_v30 = vmul.f32 %v4437_v14, %v621_v28  ;;  %1378 = vmatprep.subr.bf16.mxu1 %v3573_v22 }
  0xf9   : > { %1379 = vmatpush1.bf16.msra.mxu1 %v3572_v25  ;;  %5390 = vst [vmem:[#allocation16_spill] sm:$0xff] %v4469_v50  ;;  %5391 = vst [vmem:[#allocation17_spill] sm:$0xff] %v4472_v51 }
  0xfa   : > { %v524_v6 = vpop.permute.xlu1 %523  ;;  %v522_v7 = vpop.permute.xlu0 %521  ;;  %v3566_v35 = vpack.c.bf16 %v643_v29, %v639_v30 }
  0xfc   : > { %1338 = vmatpush1.bf16.msra.mxu0 %v3566_v35 }
  0xfe   : > { %v528_v44 = vpop.permute.xlu1 %527  ;;  %v526_v0 = vpop.permute.xlu0 %525 }
  0xff   : > { %v543_v2 = vsel %vm537_vm6, %v524_v6, %v528_v44  ;;  %v542_v45 = vsel %vm537_vm6, %v522_v7, %v526_v0 }
 0x100   : > { %v567_v46 = vmul.f32 %v4460_v38, %v543_v2  ;;  %v563_v33 = vmul.f32 %v4460_v38, %v542_v45  ;;  %v4507_v2 = vrot.slane %v4300_v41, %v548_v34  ;;  %v4510_v45 = vrot.slane %v4295_v40, %v548_v34 }
 0x102   : > { %v609_v52 = vpop.permute.xlu1 %608  ;;  %v607_v56 = vpop.permute.xlu0 %606  ;;  %v3563_v43 = vpack.c.bf16 %v567_v46, %v563_v33  ;;  %5394 = vst [vmem:[#allocation20_spill] sm:$0xff] %v4507_v2  ;;  %5395 = vst [vmem:[#allocation21_spill] sm:$0xff] %v4510_v45 }
 0x103   : > { %v616_v58 = vsel %vm614_vm5, %v609_v52, %v613_v5  ;;  %v618_v63 = vsel %vm614_vm5, %v605_v54, %v609_v52  ;;  %v615_v8 = vsel %vm614_vm5, %v607_v56, %v611_v21  ;;  %v617_v12 = vsel %vm614_vm5, %v603_v55, %v607_v56 }
 0x104   : > { %v645_v47 = vmul.f32 %v4469_v50, %v618_v63  ;;  %v646_v15 = vmul.f32 %v4472_v51, %v616_v58  ;;  %v641_v17 = vmul.f32 %v4469_v50, %v617_v12  ;;  %v642_v1 = vmul.f32 %v4472_v51, %v615_v8  ;;  %1339 = vmatprep.subr.bf16.mxu0 %v3563_v43 }
 0x105   : > { %v471_v21 = vsub.s32 0, %v4226_v9 }
 0x106   : > { %v536_v3 = vpop.permute.xlu1 %535  ;;  %v534_v11 = vpop.permute.xlu0 %533  ;;  %v3569_v19 = vpack.c.bf16 %v646_v15, %v642_v1  ;;  %v3568_v20 = vpack.c.bf16 %v645_v47, %v641_v17 }
 0x107   : > { %v545_v54 = vsel %vm537_vm6, %v536_v3, %v524_v6  ;;  %v544_v4 = vsel %vm537_vm6, %v534_v11, %v522_v7  ;;  %v4498_v28 = vrot.slane %v4241_v13, %v471_v21  ;;  %v4513_v52 = vrot.slane %v4258_v18, %v471_v21 }
 0x108   : > { %v566_v55 = vmul.f32 %v4475_v57, %v545_v54  ;;  %v562_v5 = vmul.f32 %v4475_v57, %v544_v4  ;;  %1380 = vmatprep.subr.bf16.mxu1 %v3569_v19  ;;  %v4534_v19 = vrot.slane %v4300_v41, %v471_v21 }
 0x109   : > { %1381 = vmatpush1.bf16.msra.mxu1 %v3568_v20  ;;  %5393 = vst [vmem:[#allocation19_spill] sm:$0xff] %v4498_v28  ;;  %5396 = vst [vmem:[#allocation22_spill] sm:$0xff] %v4513_v52  ;;  %v4537_v20 = vrot.slane %v4295_v40, %v471_v21 }
 0x10a   : > { %v445_v22 = vpop.permute.xlu1 %444  ;;  %v443_v25 = vpop.permute.xlu0 %442  ;;  %v3562_v26 = vpack.c.bf16 %v566_v55, %v562_v5  ;;  %5397 = vst [vmem:[#allocation23_spill] sm:$0xff] %v4534_v19 }
 0x10b   : > { %5398 = vst [vmem:[#allocation24_spill] sm:$0xff] %v4537_v20 }
 0x10c   : > { %1340 = vmatpush1.bf16.msra.mxu0 %v3562_v26 }
 0x10e   : > { %v449_v29 = vpop.permute.xlu1 %448  ;;  %v447_v30 = vpop.permute.xlu0 %446 }
 0x10f   : > { %v466_v6 = vsel %vm460_vm7, %v445_v22, %v449_v29  ;;  %v465_v7 = vsel %vm460_vm7, %v443_v25, %v447_v30 }
 0x110   : > { %v490_v9 = vmul.f32 %v4498_v28, %v466_v6  ;;  %v486_v35 = vmul.f32 %v4498_v28, %v465_v7 }
 0x112   : > { %v532_v13 = vpop.permute.xlu1 %531  ;;  %v530_v46 = vpop.permute.xlu0 %529  ;;  %v3559_v33 = vpack.c.bf16 %v490_v9, %v486_v35 }
 0x113   : > { %v539_v56 = vsel %vm537_vm6, %v532_v13, %v536_v3  ;;  %v541_v43 = vsel %vm537_vm6, %v528_v44, %v532_v13  ;;  %v538_v58 = vsel %vm537_vm6, %v530_v46, %v534_v11  ;;  %v540_v63 = vsel %vm537_vm6, %v526_v0, %v530_v46 }
 0x114   : > { %v568_v34 = vmul.f32 %v4507_v2, %v541_v43  ;;  %v569_v8 = vmul.f32 %v4510_v45, %v539_v56  ;;  %v564_v12 = vmul.f32 %v4507_v2, %v540_v63  ;;  %v565_v18 = vmul.f32 %v4510_v45, %v538_v58  ;;  %1341 = vmatprep.subr.bf16.mxu0 %v3559_v33  ;;  %v4562_v63 = vld [vmem:[%s5326_s10 + $0x20] ss:$0 sm:$0xff] }
 0x116   : > { %v457_v47 = vpop.permute.xlu1 %456  ;;  %v455_v15 = vpop.permute.xlu0 %454  ;;  %v3565_v17 = vpack.c.bf16 %v569_v8, %v565_v18  ;;  %v3564_v1 = vpack.c.bf16 %v568_v34, %v564_v12 }
 0x117   : > { %v468_v44 = vsel %vm460_vm7, %v457_v47, %v445_v22  ;;  %v467_v3 = vsel %vm460_vm7, %v455_v15, %v443_v25 }
 0x118   : > { %v489_v0 = vmul.f32 %v4513_v52, %v468_v44  ;;  %v485_v11 = vmul.f32 %v4513_v52, %v467_v3  ;;  %1382 = vmatprep.subr.bf16.mxu1 %v3565_v17  ;;  %v3342_v44 = vld [vmem:[%s5326_s10 + $0x38] ss:$0 sm:$0xff] }
 0x119   : > { %1383 = vmatpush1.bf16.msra.mxu1 %v3564_v1  ;;  %v3341_v1 = vld [vmem:[%s5326_s10 + $0x30] ss:$0 sm:$0xff] }
 0x11a   : > { %v453_v54 = vpop.permute.xlu1 %452  ;;  %v451_v4 = vpop.permute.xlu0 %450  ;;  %v3558_v55 = vpack.c.bf16 %v489_v0, %v485_v11 }
 0x11b   : > { %v462_v5 = vsel %vm460_vm7, %v453_v54, %v457_v47  ;;  %v464_v22 = vsel %vm460_vm7, %v449_v29, %v453_v54  ;;  %v461_v25 = vsel %vm460_vm7, %v451_v4, %v455_v15  ;;  %v463_v41 = vsel %vm460_vm7, %v447_v30, %v451_v4  ;;  %v3340_v29 = vld [vmem:[%s5326_s10 + $0x28] ss:$0 sm:$0xff] }
 0x11c   : > { %v491_v26 = vmul.f32 %v4534_v19, %v464_v22  ;;  %v492_v40 = vmul.f32 %v4537_v20, %v462_v5  ;;  %v487_v21 = vmul.f32 %v4534_v19, %v463_v41  ;;  %v488_v6 = vmul.f32 %v4537_v20, %v461_v25  ;;  %1342 = vmatpush1.bf16.msra.mxu0 %v3558_v55  ;;  %v3781_v22 = vld [vmem:[%s5317_s1] ss:$8 sps:$4 sm:$0xff]  }
 0x11e   : > { %v1018_v7 = vpop.permute.xlu1 %1017  ;;  %v1016_v9 = vpop.permute.xlu0 %1015  ;;  %v3561_v35 = vpack.c.bf16 %v492_v40, %v488_v6  ;;  %v3560_v13 = vpack.c.bf16 %v491_v26, %v487_v21 }
 0x120   : > { %1384 = vmatprep.subr.bf16.mxu1 %v3561_v35 }
 0x121   : > { %1385 = vmatpush1.bf16.msra.mxu1 %v3560_v13 }
 0x122   : > { %v1022_v30 = vpop.permute.xlu1 %1021  ;;  %v1020_v46 = vpop.permute.xlu0 %1019 }
 0x123   : > { %v1031_v33 = vsel %vm1027_vm8, %v1018_v7, %v1022_v30  ;;  %v1030_v56 = vsel %vm1027_vm8, %v1016_v9, %v1020_v46 }
 0x124   : > { %v1057_v43 = vmul.f32 %v3340_v29, %v1031_v33  ;;  %v1053_v58 = vmul.f32 %v3340_v29, %v1030_v56 }
 0x126   : > { %v1014_v34 = vpop.permute.xlu1 %1013  ;;  %v1012_v8 = vpop.permute.xlu0 %1011  ;;  %v3591_v12 = vpack.c.bf16 %v1057_v43, %v1053_v58 }
 0x127   : > { %v1033_v18 = vsel %vm1027_vm8, %v1014_v34, %v1018_v7  ;;  %v1032_v47 = vsel %vm1027_vm8, %v1012_v8, %v1016_v9 }
 0x128   : > { %v1056_v15 = vmul.f32 %v4562_v63, %v1033_v18  ;;  %v1052_v17 = vmul.f32 %v4562_v63, %v1032_v47  ;;  %1357 = vmatprep.subr.bf16.mxu0 %v3591_v12 }
 0x12a   : > { %v1026_v3 = vpop.permute.xlu1 %1025  ;;  %v1024_v0 = vpop.permute.xlu0 %1023  ;;  %v3590_v11 = vpack.c.bf16 %v1056_v15, %v1052_v17 }
 0x12b   : > { %v1029_v54 = vsel %vm1027_vm8, %v1022_v30, %v1026_v3  ;;  %v1035_v4 = vsel %vm1027_vm8, %v1026_v3, %v1014_v34  ;;  %v1028_v55 = vsel %vm1027_vm8, %v1020_v46, %v1024_v0  ;;  %v1034_v5 = vsel %vm1027_vm8, %v1024_v0, %v1012_v8 }
 0x12c   : > { %v1058_v25 = vmul.f32 %v3341_v1, %v1029_v54  ;;  %v1059_v41 = vmul.f32 %v3342_v44, %v1035_v4  ;;  %v1054_v26 = vmul.f32 %v3341_v1, %v1028_v55  ;;  %v1055_v40 = vmul.f32 %v3342_v44, %v1034_v5  ;;  %1358 = vmatpush2.bf16.msra.mxu0 %v3590_v11  ;;  %v4590_v11 = vld [vmem:[%s5325_s9] sm:$0xff]  ;;  %v4599_v55 = vld [vmem:[%s5325_s9 + $0x8] sm:$0xff] }
 0x12d   : > { %5399 = vst [vmem:[#allocation25_spill] sm:$0xff] %v4590_v11 }
 0x12e   : > { %v3593_v21 = vpack.c.bf16 %v1059_v41, %v1055_v40  ;;  %v3592_v6 = vpack.c.bf16 %v1058_v25, %v1054_v26 }
 0x12f   : > { %1360 = vmatmul.mubr.bf16.vlgmr.msra.gmra.mxu0 %v3781_v22 }
 0x130   : > { %1400 = vmatprep.subr.bf16.mxu1 %v3593_v21  ;;  %3666 = vmatprep.mubr.msk.f32.mxu0 %vm1323_vm0, %v4590_v11 }
 0x131   : > { %1401 = vmatpush2.bf16.msra.mxu1 %v3592_v6 }
 0x134   : > { %1403 = vmatmul.mubr.bf16.vlgmr.msra.gmra.mxu1 %v3781_v22 }
 0x135   : > { %3673 = vmatprep.mubr.msk.f32.mxu1 %vm1323_vm0, %v4590_v11 }
 0x137   : > { %v1127_v7 = vpop.permute.xlu1 %1126 }
 0x138   : > { %v1132_v30 = vpop.permute.xlu0 %1131 }
 0x1ef   : > { %v1361_v9 = vpop.f32.mrf.mxu0 }
 0x1f0   : > { %v1362_v13 = vadd.f32 %v1361_v9, %v1127_v7 }
 0x1f1   : > { %v1363_v35 = vpop.f32.mrf.mxu0 }
 0x1f2   : > { %v1364_v29 = vadd.f32 %v1363_v35, %v1127_v7 }
 0x1f3   : > { %v1365_v46 = vpop.f32.mrf.mxu0 }
 0x1f4   : > { %v1404_v33 = vpop.f32.mrf.mxu1  ;;  %v1413_v56 = vadd.f32 %v1364_v29, %v1362_v13  ;;  %v1366_v58 = vadd.f32 %v1365_v46, %v1132_v30 }
 0x1f5   : > { %v1367_v43 = vpop.f32.mrf.mxu0  ;;  %v1405_v12 = vadd.f32 %v1404_v33, %v1127_v7 }
 0x1f6   : > { %v1368_v34 = vadd.f32 %v1367_v43, %v1132_v30  ;;  %v1406_v8 = vpop.f32.mrf.mxu1  ;;  %1414 = vadd.xlane.f32.xlu0 %v1413_v56 }
 0x1f7   : > { %v1407_v18 = vadd.f32 %v1406_v8, %v1127_v7 }
 0x1f8   : > { %v1408_v47 = vpop.f32.mrf.mxu1  ;;  %v1416_v15 = vadd.f32 %v1368_v34, %v1366_v58 }
 0x1f9   : > { %v1409_v1 = vadd.f32 %v1408_v47, %v1132_v30  ;;  %v1655_v3 = vadd.f32 %v1407_v18, %v1405_v12 }
 0x1fa   : > { %v1410_v17 = vpop.f32.mrf.mxu1  ;;  %1417 = vadd.xlane.f32.xlu1 %v1416_v15 }
 0x1fb   : > { %v1411_v44 = vadd.f32 %v1410_v17, %v1132_v30 }
 0x1fd   : > { %v1658_v0 = vadd.f32 %v1411_v44, %v1409_v1 }
 0x1fe   : > { %1656 = vadd.xlane.f32.xlu1 %v1655_v3 }
 0x1ff   : > { %1659 = vadd.xlane.f32.xlu0 %v1658_v0 }
 0x27f   : > { %v1415_v4 = vpop.xlane.xlu0 %1414 }
 0x283   : > { %v1418_v54 = vpop.xlane.xlu1 %1417 }
 0x284   : > { %3662 = vmatprep.subr.mxu0 %v1418_v54 }
 0x285   : > { %3663 = vmatpush3.msra.mxu0 %v1418_v54 }
 0x286   : > { %3664 = vmatprep.subr.mxu0 %v1415_v4 }
 0x287   : > { %3665 = vmatpush3.msra.mxu0 %v1415_v4  ;;  %v1657_v22 = vpop.xlane.xlu1 %1656 }
 0x288   : > { %3667 = vmatmul.mubr.msk.f32.vlgmr.msra.gmra.mxu0 %vm1323_vm0, %v4599_v55  ;;  %v1660_v5 = vpop.xlane.xlu0 %1659 }
 0x289   : > { %3676 = vmatprep.subr.mxu0 %v1660_v5  ;;  %3680 = vmatprep.mubr.msk.f32.mxu0 %vm1323_vm0, %v4590_v11 }
 0x28a   : > { %3677 = vmatpush3.msra.mxu0 %v1660_v5  ;;  %v420_v5 = vld [vmem:[%s5320_s4] sm:$0xff] }
 0x28b   : > { %3678 = vmatprep.subr.mxu0 %v1657_v22 }
 0x28c   : > { %3679 = vmatpush3.msra.mxu0 %v1657_v22  ;;  %v421_v22 = vld [vmem:[%s5320_s4 + $0x8] sm:$0xff] }
 0x28d   : > { %3681 = vmatmul.mubr.msk.f32.vlgmr.msra.gmra.mxu0 %vm1323_vm0, %v4599_v55 }
 0x348   : > { %v3668_v25 = vpop.f32.mrf.mxu0 }
 0x349   : > { %1507 = vperm.xlu0 %3779, %v3668_v25  }
 0x34a   : > { %v1491_v41 = vpop.f32.mrf.mxu0 }
 0x34b   : > { %1502 = vperm.xlu1 %3780, %v1491_v41  }
 0x34d   : > { %v3682_v26 = vpop.f32.mrf.mxu0 }
 0x34f   : > { %1743 = vperm.xlu1 %3780, %v3682_v26   ;;  %v1727_v40 = vpop.f32.mrf.mxu0 }
 0x350   : > { %1738 = vperm.xlu0 %3779, %v1727_v40  }
 0x3c4   : > { %v1508_v21 = vpop.permute.xlu0 %1507 }
 0x3c5   : > { %v4607_v6 = vsub.f32 %v1366_v58, %v1508_v21  ;;  %v4609_v7 = vsub.f32 %v1368_v34, %v1508_v21 }
 0x3c6   : > { %v1503_v9 = vpop.permute.xlu1 %1502 }
 0x3c7   : > { %v4611_v35 = vsub.f32 %v1362_v13, %v1503_v9  ;;  %v4613_v30 = vsub.f32 %v1364_v29, %v1503_v9  ;;  %v1516_v46 = vmul.f32 %v4607_v6, %v4607_v6  ;;  %v1517_v33 = vmul.f32 %v4609_v7, %v4609_v7 }
 0x3c9   : > { %v1521_v56 = vadd.f32 %v1517_v33, %v1516_v46  ;;  %v1514_v43 = vmul.f32 %v4611_v35, %v4611_v35  ;;  %v1515_v58 = vmul.f32 %v4613_v30, %v4613_v30 }
 0x3ca   : > { %v1744_v34 = vpop.permute.xlu1 %1743 }
 0x3cb   : > { %v4623_v8 = vsub.f32 %v1409_v1, %v1744_v34  ;;  %v4625_v13 = vsub.f32 %v1411_v44, %v1744_v34  ;;  %1522 = vadd.xlane.f32.xlu1 %v1521_v56  ;;  %v1739_v29 = vpop.permute.xlu0 %1738  ;;  %v1518_v47 = vadd.f32 %v1515_v58, %v1514_v43 }
 0x3cc   : > { %v4627_v15 = vsub.f32 %v1405_v12, %v1739_v29  ;;  %v4629_v17 = vsub.f32 %v1407_v18, %v1739_v29  ;;  %v416_v12 = vld [vmem:[%s5319_s3] sm:$0xff]  ;;  %v417_v18 = vld [vmem:[%s5319_s3 + $0x8] sm:$0xff] }
 0x3cd   : > { %1519 = vadd.xlane.f32.xlu0 %v1518_v47  ;;  %v1752_v3 = vmul.f32 %v4623_v8, %v4623_v8  ;;  %v1753_v0 = vmul.f32 %v4625_v13, %v4625_v13 }
 0x3ce   : > { %v1750_v1 = vmul.f32 %v4627_v15, %v4627_v15  ;;  %v1751_v44 = vmul.f32 %v4629_v17, %v4629_v17 }
 0x3cf   : > { %v1757_v54 = vadd.f32 %v1753_v0, %v1752_v3 }
 0x3d0   : > { %v1754_v4 = vadd.f32 %v1751_v44, %v1750_v1 }
 0x3d1   : > { %1758 = vadd.xlane.f32.xlu0 %v1757_v54 }
 0x3d2   : > { %1755 = vadd.xlane.f32.xlu1 %v1754_v4 }
 0x3e3   : > { %1617 = vperm.xlu1 %3780, %v416_v12  }
 0x3e7   : > { %1622 = vperm.xlu0 %3779, %v417_v18   ;;  %1631 = vperm.xlu1 %3780, %v420_v5  }
 0x3eb   : > { %1636 = vperm.xlu0 %3779, %v421_v22  }
 0x454   : > { %v1523_v25 = vpop.xlane.xlu1 %1522 }
 0x455   : > { %3669 = vmatprep.subr.mxu1 %v1523_v25 }
 0x456   : > { %3670 = vmatpush3.msra.mxu1 %v1523_v25  ;;  %v1520_v41 = vpop.xlane.xlu0 %1519 }
 0x457   : > { %3671 = vmatprep.subr.mxu1 %v1520_v41 }
 0x458   : > { %3672 = vmatpush3.msra.mxu1 %v1520_v41 }
 0x459   : > { %3674 = vmatmul.mubr.msk.f32.vlgmr.msra.gmra.mxu1 %vm1323_vm0, %v4599_v55 }
 0x45a   : > { %v1759_v26 = vpop.xlane.xlu0 %1758  ;;  %3687 = vmatprep.mubr.msk.f32.mxu1 %vm1323_vm0, %v4590_v11 }
 0x45b   : > { %v1756_v40 = vpop.xlane.xlu1 %1755  ;;  %3683 = vmatprep.subr.mxu1 %v1759_v26 }
 0x45c   : > { %3684 = vmatpush3.msra.mxu1 %v1759_v26 }
 0x45d   : > { %3685 = vmatprep.subr.mxu1 %v1756_v40 }
 0x45e   : > { %3686 = vmatpush3.msra.mxu1 %v1756_v40 }
 0x45f   : > { %3688 = vmatmul.mubr.msk.f32.vlgmr.msra.gmra.mxu1 %vm1323_vm0, %v4599_v55  ;;  %v4657_v55 = vpop.permute.xlu1 %1617 }
 0x462   : > { %v4659_v1 = vpop.permute.xlu0 %1622 }
 0x463   : > { %v4661_v44 = vpop.permute.xlu1 %1631 }
 0x466   : > { %v4663_v54 = vpop.permute.xlu0 %1636 }
 0x519   : > { %v3675_v21 = vpop.f32.mrf.mxu1 }
 0x51a   : > { %v1596_v9 = vadd.f32 1e-05, %v3675_v21 }
 0x51b   : > { %v1590_v46 = vpop.f32.mrf.mxu1 }
 0x51c   : > { %3787 = vrsqrt.f32 %v1596_v9  ;;  %v1591_v33 = vadd.f32 1e-05, %v1590_v46 }
 0x51e   : > { %3789 = vrsqrt.f32 %v1591_v33 }
 0x51f   : > { %v3689_v56 = vpop.f32.mrf.mxu1 }
 0x520   : > { %v1832_v43 = vadd.f32 1e-05, %v3689_v56 }
 0x521   : > { %v1826_v58 = vpop.f32.mrf.mxu1 }
 0x522   : > { %3791 = vrsqrt.f32 %v1832_v43  ;;  %v1827_v34 = vadd.f32 1e-05, %v1826_v58 }
 0x524   : > { %3793 = vrsqrt.f32 %v1827_v34 }
 0x529   : > { %v3788_v29 = vpop.eup %3787 }
 0x52a   : > { %1608 = vperm.xlu1 %3780, %v3788_v29  }
 0x52b   : > { %v3790_v47 = vpop.eup %3789 }
 0x52c   : > { %1603 = vperm.xlu0 %3779, %v3790_v47  }
 0x52f   : > { %v3792_v3 = vpop.eup %3791 }
 0x530   : > { %1844 = vperm.xlu0 %3779, %v3792_v3  }
 0x531   : > { %v3794_v0 = vpop.eup %3793 }
 0x532   : > { %1839 = vperm.xlu1 %3780, %v3794_v0  }
 0x5a5   : > { %v1609_v4 = vpop.permute.xlu1 %1608 }
 0x5a6   : > { %v1613_v12 = vmul.f32 %v1609_v4, %v4607_v6  ;;  %v1614_v18 = vmul.f32 %v1609_v4, %v4609_v7 }
 0x5a7   : > { %v1604_v5 = vpop.permute.xlu0 %1603 }
 0x5a8   : > { %v1627_v22 = vmul.f32 %v4659_v1, %v1613_v12  ;;  %v1628_v25 = vmul.f32 %v4659_v1, %v1614_v18  ;;  %v1611_v41 = vmul.f32 %v1604_v5, %v4611_v35  ;;  %v1612_v26 = vmul.f32 %v1604_v5, %v4613_v30 }
 0x5aa   : > { %v1641_v40 = vadd.f32 %v4663_v54, %v1627_v22  ;;  %v1642_v21 = vadd.f32 %v4663_v54, %v1628_v25  ;;  %v1625_v9 = vmul.f32 %v4657_v55, %v1611_v41  ;;  %v1626_v46 = vmul.f32 %v4657_v55, %v1612_v26 }
 0x5ab   : > { %v1845_v0 = vpop.permute.xlu0 %1844 }
 0x5ac   : > { %v1645_v6 = vmul.f32 0.1, %v1641_v40  ;;  %v1646_v33 = vmul.f32 0.1, %v1642_v21  ;;  %v1639_v7 = vadd.f32 %v4661_v44, %v1625_v9  ;;  %v1640_v56 = vadd.f32 %v4661_v44, %v1626_v46 }
 0x5ad   : > { %v1840_v4 = vpop.permute.xlu1 %1839  ;;  %v1849_v12 = vmul.f32 %v1845_v0, %v4623_v8  ;;  %v1850_v8 = vmul.f32 %v1845_v0, %v4625_v13 }
 0x5ae   : > { %v4677_v43 = vmax.f32 %v1642_v21, %v1646_v33  ;;  %v1643_v58 = vmul.f32 0.1, %v1639_v7  ;;  %v1644_v35 = vmul.f32 0.1, %v1640_v56  ;;  %v4679_v34 = vmax.f32 %v1641_v40, %v1645_v6 }
 0x5af   : > { %v1847_v18 = vmul.f32 %v1840_v4, %v4627_v15  ;;  %v1853_v5 = vmul.f32 %v1849_v12, %v4659_v1  ;;  %v1848_v15 = vmul.f32 %v1840_v4, %v4629_v17  ;;  %v1854_v26 = vmul.f32 %v1850_v8, %v4659_v1 }
 0x5b0   : > { %v4681_v30 = vmax.f32 %v1639_v7, %v1643_v58  ;;  %v4683_v29 = vmax.f32 %v1640_v56, %v1644_v35  ;;  %2273 = vrot.lane.b32.xlu0 %v4677_v43, %s3906_s19  ;;  %v3784_v56 = vld [vmem:[%s5321_s5 + $0x4] ss:$8 sps:$4 sm:$0xff]  }
 0x5b1   : > { %v1851_v22 = vmul.f32 %v1847_v18, %v4657_v55  ;;  %v1857_v25 = vadd.f32 %v1853_v5, %v4663_v54  ;;  %v1852_v13 = vmul.f32 %v1848_v15, %v4657_v55  ;;  %v1858_v9 = vadd.f32 %v1854_v26, %v4663_v54  ;;  %3469 = vmatprep.mubr.msk.bf16.mxu0 %vm1323_vm0, %v3784_v56  ;;  %v415_v15 = vld [vmem:[%s5322_s6 + $0x8] sm:$0xff] }
 0x5b2   : > { %2271 = vrot.lane.b32.xlu1 %v4683_v29, %s3906_s19  ;;  %3470 = vmatprep.mubr.msk.bf16.mxu1 %vm1323_vm0, %v3784_v56 }
 0x5b3   : > { %v1855_v41 = vadd.f32 %v1851_v22, %v4661_v44  ;;  %v1861_v40 = vmul.f32 0.1, %v1857_v25  ;;  %v1856_v46 = vadd.f32 %v1852_v13, %v4661_v44  ;;  %v1862_v6 = vmul.f32 0.1, %v1858_v9 }
 0x5b4   : > { %2269 = vrot.lane.b32.xlu0 %v4679_v34, %s3906_s19 }
 0x5b5   : > { %v1859_v21 = vmul.f32 0.1, %v1855_v41  ;;  %v4762_v17 = vmax.f32 %v1857_v25, %v1861_v40  ;;  %v1860_v55 = vmul.f32 0.1, %v1856_v46  ;;  %v4775_v54 = vmax.f32 %v1858_v9, %v1862_v6  ;;  %v414_v25 = vld [vmem:[%s5322_s6] sm:$0xff] }
 0x5b6   : > { %2267 = vrot.lane.b32.xlu1 %v4681_v30, %s3906_s19 }
 0x5b7   : > { %v4767_v1 = vmax.f32 %v1855_v41, %v1859_v21  ;;  %v4779_v33 = vmax.f32 %v1856_v46, %v1860_v55 }
 0x5b8   : > { %2213 = vrot.lane.b32.xlu0 %v4677_v43, %s3907_s26 }
 0x5ba   : > { %2211 = vrot.lane.b32.xlu1 %v4683_v29, %s3907_s26 }
 0x5bc   : > { %2209 = vrot.lane.b32.xlu0 %v4679_v34, %s3907_s26 }
 0x5be   : > { %2207 = vrot.lane.b32.xlu1 %v4681_v30, %s3907_s26 }
 0x5c0   : > { %2153 = vrot.lane.b32.xlu0 %v4677_v43, %s3908_s28 }
 0x5c2   : > { %2151 = vrot.lane.b32.xlu1 %v4683_v29, %s3908_s28 }
 0x5c4   : > { %2149 = vrot.lane.b32.xlu0 %v4679_v34, %s3908_s28 }
 0x5c6   : > { %2147 = vrot.lane.b32.xlu1 %v4681_v30, %s3908_s28 }
 0x5c8   : > { %2061 = vrot.lane.b32.xlu0 %v4679_v34, %s3909_s24 }
 0x5ca   : > { %2059 = vrot.lane.b32.xlu1 %v4681_v30, %s3909_s24 }
 0x5cc   : > { %2065 = vrot.lane.b32.xlu0 %v4677_v43, %s3909_s24 }
 0x5ce   : > { %2063 = vrot.lane.b32.xlu1 %v4683_v29, %s3909_s24 }
 0x5d0   : > { %2001 = vrot.lane.b32.xlu0 %v4679_v34, %s5400_s25 }
 0x5d2   : > { %1999 = vrot.lane.b32.xlu1 %v4681_v30, %s5400_s25 }
 0x5d4   : > { %2005 = vrot.lane.b32.xlu0 %v4677_v43, %s5400_s25 }
 0x5d6   : > { %2003 = vrot.lane.b32.xlu1 %v4683_v29, %s5400_s25 }
 0x5d8   : > { %1941 = vrot.lane.b32.xlu0 %v4679_v34, %s5401_s22 }
 0x5da   : > { %1939 = vrot.lane.b32.xlu1 %v4681_v30, %s5401_s22 }
 0x5dc   : > { %1945 = vrot.lane.b32.xlu0 %v4677_v43, %s5401_s22 }
 0x5de   : > { %1943 = vrot.lane.b32.xlu1 %v4683_v29, %s5401_s22 }
 0x5e0   : > { %1881 = vrot.lane.b32.xlu0 %v4679_v34, %s5402_s15 }
 0x5e2   : > { %1879 = vrot.lane.b32.xlu1 %v4681_v30, %s5402_s15 }
 0x5e4   : > { %1885 = vrot.lane.b32.xlu0 %v4677_v43, %s5402_s15 }
 0x5e6   : > { %1883 = vrot.lane.b32.xlu1 %v4683_v29, %s5402_s15 }
 0x5e8   : > { %2333 = vrot.lane.b32.xlu0 %v4677_v43, %s5403_s14 }
 0x5ea   : > { %2331 = vrot.lane.b32.xlu1 %v4683_v29, %s5403_s14 }
 0x5ec   : > { %2329 = vrot.lane.b32.xlu0 %v4679_v34, %s5403_s14 }
 0x5ee   : > { %2327 = vrot.lane.b32.xlu1 %v4681_v30, %s5403_s14 }
 0x5f0   : > { %2277 = vrot.lane.b32.xlu0 %v4762_v17, %s3906_s19 }
 0x5f2   : > { %2275 = vrot.lane.b32.xlu1 %v4767_v1, %s3906_s19 }
 0x5f4   : > { %2217 = vrot.lane.b32.xlu0 %v4762_v17, %s3907_s26 }
 0x5f6   : > { %2215 = vrot.lane.b32.xlu1 %v4767_v1, %s3907_s26 }
 0x5f8   : > { %2281 = vrot.lane.b32.xlu0 %v4775_v54, %s3906_s19 }
 0x5fa   : > { %2279 = vrot.lane.b32.xlu1 %v4779_v33, %s3906_s19 }
 0x5fc   : > { %2157 = vrot.lane.b32.xlu0 %v4762_v17, %s3908_s28 }
 0x5fe   : > { %2155 = vrot.lane.b32.xlu1 %v4767_v1, %s3908_s28 }
 0x600   : > { %2221 = vrot.lane.b32.xlu0 %v4775_v54, %s3907_s26 }
 0x602   : > { %2219 = vrot.lane.b32.xlu1 %v4779_v33, %s3907_s26 }
 0x604   : > { %2161 = vrot.lane.b32.xlu0 %v4775_v54, %s3908_s28 }
 0x606   : > { %2159 = vrot.lane.b32.xlu1 %v4779_v33, %s3908_s28  ;;  %s5439_s28 = sshll.u32 %s4078_s30, 6 }
 0x608   : > { %2073 = vrot.lane.b32.xlu0 %v4775_v54, %s3909_s24 }
 0x60a   : > { %2071 = vrot.lane.b32.xlu1 %v4779_v33, %s3909_s24 }
 0x60c   : > { %2069 = vrot.lane.b32.xlu0 %v4762_v17, %s3909_s24 }
 0x60e   : > { %2067 = vrot.lane.b32.xlu1 %v4767_v1, %s3909_s24  ;;  %s404_s24 = scalar_lea.vmem [#allocation7], %s5439_s28 }
 0x60f   : > { %s3225_s16 = sshll.u32 %s404_s24, 4  ;;  %s5273_s16 = int_to_ptr.vmem [resolvable:$true] %s3225_s16 }
 0x610   : > { %2013 = vrot.lane.b32.xlu0 %v4775_v54, %s5400_s25 }
 0x612   : > { %2011 = vrot.lane.b32.xlu1 %v4779_v33, %s5400_s25 }
 0x614   : > { %2009 = vrot.lane.b32.xlu0 %v4762_v17, %s5400_s25 }
 0x616   : > { %2007 = vrot.lane.b32.xlu1 %v4767_v1, %s5400_s25  ;;  %s3836_s25 = scalar_lea.vmem %s5273_s16, 1024 }
 0x617   : > { %p3837_p11 = scmp.ne.s32.totalorder %s5273_s16, %s3836_s25 }
 0x618   : > { %1953 = vrot.lane.b32.xlu0 %v4775_v54, %s5401_s22 }
 0x619   : > { %p3838_p13 = pnand %p3837_p11, %p5440_p12 }
 0x61a   : > { %1951 = vrot.lane.b32.xlu1 %v4779_v33, %s5401_s22 }
 0x61b   : > { %p3839_p4 = pneg %p3838_p13 }
 0x61c   : > { %1949 = vrot.lane.b32.xlu0 %v4762_v17, %s5401_s22 }
 0x61e   : > { %1947 = vrot.lane.b32.xlu1 %v4767_v1, %s5401_s22  ;;  %s3915_s22 = smov [#allocation7]  }
 0x620   : > { %1893 = vrot.lane.b32.xlu0 %v4775_v54, %s5402_s15 }
 0x622   : > { %1891 = vrot.lane.b32.xlu1 %v4779_v33, %s5402_s15  ;;  %v2274_v44 = vpop.permute.xlu0 %2273 }
 0x624   : > { %v2272_v7 = vpop.permute.xlu1 %2271  ;;  %1889 = vrot.lane.b32.xlu0 %v4762_v17, %s5402_s15 }
 0x626   : > { %1887 = vrot.lane.b32.xlu1 %v4767_v1, %s5402_s15  ;;  %v4832_v58 = vpop.permute.xlu0 %2269  ;;  %s3840_s15 = sshll.u32 %s3915_s22, 4  ;;  %s3841_s15 = int_to_ptr.vmem [resolvable:$false] %s3840_s15 }
 0x627   : > { %v2288_v35 = vsel %vm950_vm1, %v4832_v58, %v2274_v44  ;;  %p3843_p5 = scmp.lt.s32.totalorder %s5273_s16, %s3841_s15 }
 0x628   : > { %v4839_v0 = vpop.permute.xlu1 %2267  ;;  %2337 = vrot.lane.b32.xlu0 %v4762_v17, %s5403_s14  ;;  %v4847_v12 = vmul.f32 %v2288_v35, %v4269_v24 }
 0x629   : > { %v2287_v4 = vsel %vm950_vm1, %v4839_v0, %v2272_v7 }
 0x62a   : > { %v4850_v18 = vmul.f32 %v2287_v4, %v4269_v24  ;;  %2335 = vrot.lane.b32.xlu1 %v4767_v1, %s5403_s14  ;;  %v2214_v5 = vpop.permute.xlu0 %2213 }
 0x62c   : > { %v3622_v22 = vpack.c.bf16 %v4847_v12, %v4850_v18  ;;  %v2212_v8 = vpop.permute.xlu1 %2211  ;;  %2341 = vrot.lane.b32.xlu0 %v4775_v54, %s5403_s14 }
 0x62e   : > { %2339 = vrot.lane.b32.xlu1 %v4779_v33, %s5403_s14  ;;  %v4863_v24 = vpop.permute.xlu0 %2209  ;;  %s3842_s14 = scalar_lea.vmem %s3841_s15, 2048 }
 0x62f   : > { %p3844_p7 = scmp.lt.s32.totalorder %s3842_s14, %s3836_s25 }
 0x630   : > { %v4868_v41 = vpop.permute.xlu1 %2207  ;;  %2425 = vperm.xlu0 %3779, %v414_v25  }
 0x631   : > { %p3845_p8 = por %p3844_p7, %p3843_p5 }
 0x632   : > { %2430 = vperm.xlu1 %3780, %v415_v15   ;;  %v4870_v26 = vpop.permute.xlu0 %2153 }
 0x633   : > { %p3846_p10 = pnand %p3845_p8, %p3839_p4 }
 0x634   : > { %v4872_v40 = vpop.permute.xlu1 %2151 }
 0x636   : > { %v4874_v13 = vpop.permute.xlu0 %2149 }
 0x638   : > { %v4876_v21 = vpop.permute.xlu1 %2147 }
 0x63a   : > { %v4878_v9 = vpop.permute.xlu0 %2061 }
 0x63c   : > { %v4880_v46 = vpop.permute.xlu1 %2059 }
 0x63e   : > { %v4882_v6 = vpop.permute.xlu0 %2065 }
 0x640   : > { %v4884_v55 = vpop.permute.xlu1 %2063 }
 0x642   : > { %v4886_v56 = vpop.permute.xlu0 %2001 }
 0x644   : > { %v4888_v35 = vpop.permute.xlu1 %1999 }
 0x646   : > { %v4890_v4 = vpop.permute.xlu0 %2005 }
 0x648   : > { %v4892_v12 = vpop.permute.xlu1 %2003 }
 0x64a   : > { %v4894_v18 = vpop.permute.xlu0 %1941 }
 0x64c   : > { %v4896_v25 = vpop.permute.xlu1 %1939 }
 0x64e   : > { %v4898_v15 = vpop.permute.xlu0 %1945 }
 0x650   : > { %v4900_v3 = vpop.permute.xlu1 %1943 }
 0x652   : > { %v4902_v47 = vpop.permute.xlu0 %1881 }
 0x653   : > { %5404 = vst [vmem:[#allocation26_spill] sm:$0xff] %v4902_v47 }
 0x654   : > { %v4904_v11 = vpop.permute.xlu1 %1879 }
 0x655   : > { %5405 = vst [vmem:[#allocation27_spill] sm:$0xff] %v4904_v11 }
 0x656   : > { %v4906_v20 = vpop.permute.xlu0 %1885 }
 0x657   : > { %5406 = vst [vmem:[#allocation28_spill] sm:$0xff] %v4906_v20 }
 0x658   : > { %v4908_v19 = vpop.permute.xlu1 %1883 }
 0x659   : > { %5407 = vst [vmem:[#allocation29_spill] sm:$0xff] %v4908_v19 }
 0x65a   : > { %v4910_v52 = vpop.permute.xlu0 %2333 }
 0x65b   : > { %5408 = vst [vmem:[#allocation30_spill] sm:$0xff] %v4910_v52 }
 0x65c   : > { %v4912_v45 = vpop.permute.xlu1 %2331 }
 0x65d   : > { %5409 = vst [vmem:[#allocation31_spill] sm:$0xff] %v4912_v45 }
 0x65e   : > { %v4914_v2 = vpop.permute.xlu0 %2329 }
 0x65f   : > { %5410 = vst [vmem:[#allocation32_spill] sm:$0xff] %v4914_v2  ;;  %v2348_v57 = vsel %vm1027_vm8, %v4914_v2, %v4910_v52 }
 0x660   : > { %v4920_v28 = vpop.permute.xlu1 %2327  ;;  %v4927_v20 = vmul.f32 %v4562_v63, %v2348_v57 }
 0x661   : > { %5411 = vst [vmem:[#allocation33_spill] sm:$0xff] %v4920_v28  ;;  %v2347_v47 = vsel %vm1027_vm8, %v4920_v28, %v4912_v45  ;;  %v2227_v28 = vsel %vm873_vm2, %v4868_v41, %v2212_v8 }
 0x662   : > { %5412 = vst [vmem:[#allocation34_spill] sm:$0xff] %v4927_v20  ;;  %v4930_v51 = vmul.f32 %v4562_v63, %v2347_v47  ;;  %v2278_v50 = vpop.permute.xlu0 %2277 }
 0x663   : > { %v2286_v11 = vsel %vm950_vm1, %v2274_v44, %v2278_v50  ;;  %v2228_v44 = vsel %vm873_vm2, %v4863_v24, %v2214_v5 }
 0x664   : > { %5413 = vst [vmem:[#allocation35_spill] sm:$0xff] %v4930_v51  ;;  %v2276_v52 = vpop.permute.xlu1 %2275  ;;  %v2296_v57 = vmul.f32 %v2286_v11, %v4251_v16 }
 0x665   : > { %v2285_v19 = vsel %vm950_vm1, %v2272_v7, %v2276_v52  ;;  %v2231_v7 = vmul.f32 %v2227_v28, %v4315_v53 }
 0x666   : > { %v2292_v63 = vmul.f32 %v2285_v19, %v4251_v16  ;;  %v2218_v47 = vpop.permute.xlu0 %2217  ;;  %v2235_v19 = vmul.f32 %v2228_v44, %v4315_v53 }
 0x667   : > { %v2226_v45 = vsel %vm873_vm2, %v2214_v5, %v2218_v47 }
 0x668   : > { %v2216_v2 = vpop.permute.xlu1 %2215  ;;  %v3623_v51 = vpack.c.bf16 %v2296_v57, %v2292_v63  ;;  %v2236_v14 = vmul.f32 %v2226_v45, %v4290_v39  ;;  %v3618_v63 = vpack.c.bf16 %v2235_v19, %v2231_v7 }
 0x669   : > { %v2225_v20 = vsel %vm873_vm2, %v2212_v8, %v2216_v2 }
 0x66a   : > { %v2232_v11 = vmul.f32 %v2225_v20, %v4290_v39  ;;  %2625 = vmatprep.subr.bf16.mxu0 %v3623_v51  ;;  %v2282_v16 = vpop.permute.xlu0 %2281  ;;  %v2167_v39 = vsel %vm796_vm3, %v4876_v21, %v4872_v40 }
 0x66b   : > { %v2284_v38 = vsel %vm950_vm1, %v2278_v50, %v2282_v16  ;;  %v2290_v5 = vsel %vm950_vm1, %v2282_v16, %v4832_v58  ;;  %2626 = vmatpush1.bf16.msra.mxu0 %v3622_v22  ;;  %v2171_v44 = vmul.f32 %v2167_v39, %v4353_v37  ;;  %v5436_v10 = vld [vmem:[#allocation35_spill] sm:$0xff] }
 0x66c   : > { %v2280_v28 = vpop.permute.xlu1 %2279  ;;  %v3619_v57 = vpack.c.bf16 %v2236_v14, %v2232_v11  ;;  %v2297_v50 = vmul.f32 %v2284_v38, %v4312_v49  ;;  %v2298_v45 = vmul.f32 %v2290_v5, %v4309_v48  ;;  %v2080_v5 = vsel %vm691_vm4, %v4878_v9, %v4882_v6 }
 0x66d   : > { %v2283_v51 = vsel %vm950_vm1, %v2276_v52, %v2280_v28  ;;  %v2289_v53 = vsel %vm950_vm1, %v2280_v28, %v4839_v0  ;;  %v2168_v52 = vsel %vm796_vm3, %v4874_v13, %v4870_v26 }
 0x66e   : > { %v2293_v20 = vmul.f32 %v2283_v51, %v4312_v49  ;;  %v2294_v14 = vmul.f32 %v2289_v53, %v4309_v48  ;;  %2627 = vmatprep.subr.bf16.mxu0 %v3619_v57  ;;  %v2158_v58 = vpop.permute.xlu0 %2157  ;;  %v2079_v49 = vsel %vm691_vm4, %v4880_v46, %v4884_v55  ;;  %v2175_v16 = vmul.f32 %v2168_v52, %v4353_v37 }
 0x66f   : > { %v2166_v22 = vsel %vm796_vm3, %v4870_v26, %v2158_v58  ;;  %2628 = vmatpush1.bf16.msra.mxu0 %v3618_v63  ;;  %v2084_v63 = vmul.f32 %v2079_v49, %v4400_v27 }
 0x670   : > { %v3624_v0 = vpack.c.bf16 %v2297_v50, %v2293_v20  ;;  %v2156_v38 = vpop.permute.xlu1 %2155  ;;  %v3625_v8 = vpack.c.bf16 %v2298_v45, %v2294_v14  ;;  %v2176_v7 = vmul.f32 %v2166_v22, %v4338_v23  ;;  %v2088_v45 = vmul.f32 %v2080_v5, %v4400_v27 }
 0x671   : > { %v2165_v48 = vsel %vm796_vm3, %v4872_v40, %v2156_v38  ;;  %v5414_v22 = vpack.c.bf16 %v4677_v43, %v4683_v29 }
 0x672   : > { %v2172_v11 = vmul.f32 %v2165_v48, %v4338_v23  ;;  %2668 = vmatprep.subr.bf16.mxu1 %v3625_v8  ;;  %v2222_v26 = vpop.permute.xlu0 %2221  ;;  %v3614_v23 = vpack.c.bf16 %v2175_v16, %v2171_v44 }
 0x673   : > { %v2224_v19 = vsel %vm873_vm2, %v2218_v47, %v2222_v26  ;;  %v2230_v40 = vsel %vm873_vm2, %v2222_v26, %v4863_v24  ;;  %2669 = vmatpush1.bf16.msra.mxu1 %v3624_v0 }
 0x674   : > { %v2220_v28 = vpop.permute.xlu1 %2219  ;;  %v3615_v57 = vpack.c.bf16 %v2176_v7, %v2172_v11  ;;  %v2237_v24 = vmul.f32 %v2224_v19, %v4347_v31  ;;  %v2238_v39 = vmul.f32 %v2230_v40, %v4350_v32  ;;  %v3613_v11 = vpack.c.bf16 %v4775_v54, %v4779_v33 }
 0x675   : > { %v2223_v37 = vsel %vm873_vm2, %v2216_v2, %v2220_v28  ;;  %v2229_v47 = vsel %vm873_vm2, %v2220_v28, %v4868_v41  ;;  %v1959_v54 = vsel %vm537_vm6, %v4896_v25, %v4900_v3 }
 0x676   : > { %v2233_v51 = vmul.f32 %v2223_v37, %v4347_v31  ;;  %v2234_v53 = vmul.f32 %v2229_v47, %v4350_v32  ;;  %2629 = vmatprep.subr.bf16.mxu0 %v3615_v57  ;;  %v2162_v50 = vpop.permute.xlu0 %2161  ;;  %v2019_v32 = vsel %vm614_vm5, %v4888_v35, %v4892_v12 }
 0x677   : > { %v2164_v20 = vsel %vm796_vm3, %v2158_v58, %v2162_v50  ;;  %v2170_v2 = vsel %vm796_vm3, %v2162_v50, %v4874_v13  ;;  %2630 = vmatpush1.bf16.msra.mxu0 %v3614_v23  ;;  %v3607_v58 = vpack.c.bf16 %v2088_v45, %v2084_v63  ;;  %v2024_v49 = vmul.f32 %v2019_v32, %v4422_v42 }
 0x678   : > { %v3620_v41 = vpack.c.bf16 %v2237_v24, %v2233_v51  ;;  %v2160_v14 = vpop.permute.xlu1 %2159  ;;  %2631 = vmatprep.subr.bf16.mxu0 %v5414_v22  ;;  %v3621_v31 = vpack.c.bf16 %v2238_v39, %v2234_v53  ;;  %v2177_v52 = vmul.f32 %v2164_v20, %v4374_v59  ;;  %v2178_v0 = vmul.f32 %v2170_v2, %v4377_v60  ;;  %v5416_v24 = vld [vmem:[#allocation15_spill] sm:$0xff]  ;;  %v5417_v39 = vld [vmem:[#allocation14_spill] sm:$0xff] }
 0x679   : > { %v2163_v27 = vsel %vm796_vm3, %v2156_v38, %v2160_v14  ;;  %v2169_v13 = vsel %vm796_vm3, %v2160_v14, %v4876_v21  ;;  %v5415_v38 = vpack.c.bf16 %v4679_v34, %v4681_v30  ;;  %v2020_v21 = vsel %vm614_vm5, %v4886_v56, %v4890_v4  ;;  %v5418_v14 = vld [vmem:[#allocation29_spill] sm:$0xff] }
 0x67a   : > { %v2173_v43 = vmul.f32 %v2163_v27, %v4374_v59  ;;  %v2174_v29 = vmul.f32 %v2169_v13, %v4377_v60  ;;  %2670 = vmatprep.subr.bf16.mxu1 %v3621_v31  ;;  %v2074_v8 = vpop.permute.xlu0 %2073  ;;  %v2028_v26 = vmul.f32 %v2020_v21, %v4422_v42  ;;  %v5420_v13 = vld [vmem:[#allocation16_spill] sm:$0xff] }
 0x67b   : > { %v2082_v44 = vsel %vm691_vm4, %v2074_v8, %v4878_v9  ;;  %2632 = vmatpush1.bf16.msra.mxu0 %v5415_v38  ;;  %2671 = vmatpush1.bf16.msra.mxu1 %v3620_v41  ;;  %v5423_v38 = vld [vmem:[#allocation26_spill] sm:$0xff] }
 0x67c   : > { %v3616_v48 = vpack.c.bf16 %v2177_v52, %v2173_v43  ;;  %v2072_v59 = vpop.permute.xlu1 %2071  ;;  %2633 = vmatprep.subr.bf16.mxu0 %v3607_v58  ;;  %v3617_v60 = vpack.c.bf16 %v2178_v0, %v2174_v29  ;;  %v2087_v7 = vmul.f32 %v2082_v44, %v4411_v36  ;;  %v5421_v52 = vld [vmem:[#allocation17_spill] sm:$0xff]  ;;  %v5422_v44 = vld [vmem:[#allocation28_spill] sm:$0xff] }
 0x67d   : > { %v2081_v9 = vsel %vm691_vm4, %v2072_v59, %v4880_v46 }
 0x67e   : > { %v2083_v34 = vmul.f32 %v2081_v9, %v4411_v36  ;;  %2672 = vmatprep.subr.bf16.mxu1 %v3617_v60  ;;  %v2070_v30 = vpop.permute.xlu0 %2069  ;;  %v3612_v36 = vpack.c.bf16 %v4762_v17, %v4767_v1  ;;  %v5424_v60 = vld [vmem:[#allocation19_spill] sm:$0xff] }
 0x67f   : > { %v2076_v16 = vsel %vm691_vm4, %v2070_v30, %v2074_v8  ;;  %v2078_v19 = vsel %vm691_vm4, %v4882_v6, %v2070_v30  ;;  %2673 = vmatpush1.bf16.msra.mxu1 %v3616_v48  ;;  %v3603_v6 = vpack.c.bf16 %v2028_v26, %v2024_v49 }
 0x680   : > { %v3606_v46 = vpack.c.bf16 %v2087_v7, %v2083_v34  ;;  %v2068_v40 = vpop.permute.xlu1 %2067  ;;  %2674 = vmatprep.subr.bf16.mxu1 %v3613_v11  ;;  %v2089_v5 = vmul.f32 %v2078_v19, %v4431_v61  ;;  %v2090_v28 = vmul.f32 %v2076_v16, %v4434_v62  ;;  %v5425_v7 = vld [vmem:[#allocation18_spill] sm:$0xff] }
 0x681   : > { %v2075_v42 = vsel %vm691_vm4, %v2068_v40, %v2072_v59  ;;  %v2077_v33 = vsel %vm691_vm4, %v4884_v55, %v2068_v40  ;;  %v1960_v55 = vsel %vm537_vm6, %v4894_v18, %v4898_v15 }
 0x682   : > { %v2085_v57 = vmul.f32 %v2077_v33, %v4431_v61  ;;  %v2086_v17 = vmul.f32 %v2075_v42, %v4434_v62  ;;  %2634 = vmatpush1.bf16.msra.mxu0 %v3606_v46  ;;  %v2014_v1 = vpop.permute.xlu0 %2013  ;;  %v1964_v61 = vmul.f32 %v1959_v54, %v5416_v24  ;;  %v1968_v50 = vmul.f32 %v1960_v55, %v5416_v24  ;;  %v5426_v54 = vld [vmem:[#allocation20_spill] sm:$0xff]  ;;  %v5427_v33 = vld [vmem:[#allocation21_spill] sm:$0xff]  ;;  %v5428_v55 = vld [vmem:[#allocation22_spill] sm:$0xff] }
 0x683   : > { %v2022_v23 = vsel %vm614_vm5, %v2014_v1, %v4886_v56  ;;  %2635 = vmatprep.subr.bf16.mxu0 %v3603_v6  ;;  %2675 = vmatpush1.bf16.msra.mxu1 %v3612_v36 }
 0x684   : > { %v3608_v63 = vpack.c.bf16 %v2089_v5, %v2085_v57  ;;  %v2012_v37 = vpop.permute.xlu1 %2011  ;;  %v3609_v47 = vpack.c.bf16 %v2090_v28, %v2086_v17  ;;  %v2027_v51 = vmul.f32 %v2022_v23, %v5417_v39  ;;  %v3599_v27 = vpack.c.bf16 %v1968_v50, %v1964_v61 }
 0x685   : > { %v2021_v62 = vsel %vm614_vm5, %v2012_v37, %v4888_v35  ;;  %v5419_v35 = vld [vmem:[#allocation27_spill] sm:$0xff] }
 0x686   : > { %v2023_v56 = vmul.f32 %v2021_v62, %v5417_v39  ;;  %2676 = vmatprep.subr.bf16.mxu1 %v3609_v47  ;;  %v2010_v53 = vpop.permute.xlu0 %2009  ;;  %v1899_v22 = vsel %vm460_vm7, %v5419_v35, %v5418_v14 }
 0x687   : > { %v2016_v45 = vsel %vm614_vm5, %v2010_v53, %v2014_v1  ;;  %v2018_v20 = vsel %vm614_vm5, %v4890_v4, %v2010_v53  ;;  %2677 = vmatpush1.bf16.msra.mxu1 %v3608_v63  ;;  %v1904_v49 = vmul.f32 %v1899_v22, %v5424_v60  ;;  %v5429_v53 = vld [vmem:[#allocation23_spill] sm:$0xff]  ;;  %v5431_v22 = vld [vmem:[#allocation30_spill] sm:$0xff] }
 0x688   : > { %v3602_v2 = vpack.c.bf16 %v2027_v51, %v2023_v56  ;;  %v2008_v41 = vpop.permute.xlu1 %2007  ;;  %v2029_v58 = vmul.f32 %v2018_v20, %v5420_v13  ;;  %v2030_v4 = vmul.f32 %v2016_v45, %v5421_v52  ;;  %v5430_v45 = vld [vmem:[#allocation24_spill] sm:$0xff] }
 0x689   : > { %v2015_v31 = vsel %vm614_vm5, %v2008_v41, %v2012_v37  ;;  %v2017_v32 = vsel %vm614_vm5, %v4892_v12, %v2008_v41  ;;  %v1900_v12 = vsel %vm460_vm7, %v5423_v38, %v5422_v44 }
 0x68a   : > { %v2025_v0 = vmul.f32 %v2017_v32, %v5420_v13  ;;  %v2026_v43 = vmul.f32 %v2015_v31, %v5421_v52  ;;  %2636 = vmatpush1.bf16.msra.mxu0 %v3602_v2  ;;  %v1954_v29 = vpop.permute.xlu0 %1953  ;;  %v1908_v11 = vmul.f32 %v1900_v12, %v5424_v60  ;;  %v3803_v52 = vld [vmem:[%s5326_s10 + $0x28] ss:$0 sm:$0xff]  ;;  %v3804_v60 = vld [vmem:[%s5326_s10 + $0x30] ss:$0 sm:$0xff] }
 0x68b   : > { %v1962_v8 = vsel %vm537_vm6, %v1954_v29, %v4894_v18  ;;  %2637 = vmatprep.subr.bf16.mxu0 %v3599_v27 }
 0x68c   : > { %v3604_v21 = vpack.c.bf16 %v2029_v58, %v2025_v0  ;;  %v1952_v48 = vpop.permute.xlu1 %1951  ;;  %v3605_v59 = vpack.c.bf16 %v2030_v4, %v2026_v43  ;;  %v1967_v34 = vmul.f32 %v1962_v8, %v5425_v7  ;;  %v3595_v36 = vpack.c.bf16 %v1908_v11, %v1904_v49  ;;  %v5432_v58 = vld [vmem:[#allocation31_spill] sm:$0xff]  ;;  %v5433_v8 = vld [vmem:[#allocation32_spill] sm:$0xff]  ;;  %v5435_v11 = vld [vmem:[#allocation34_spill] sm:$0xff] }
 0x68d   : > { %v1961_v9 = vsel %vm537_vm6, %v1952_v48, %v4896_v25 }
 0x68e   : > { %v1963_v30 = vmul.f32 %v1961_v9, %v5425_v7  ;;  %2678 = vmatprep.subr.bf16.mxu1 %v3605_v59  ;;  %v1950_v18 = vpop.permute.xlu0 %1949  ;;  %v3805_v9 = vld [vmem:[%s5326_s10 + $0x38] ss:$0 sm:$0xff] }
 0x68f   : > { %v1956_v26 = vsel %vm537_vm6, %v1950_v18, %v1954_v29  ;;  %v1958_v16 = vsel %vm537_vm6, %v4898_v15, %v1950_v18  ;;  %2679 = vmatpush1.bf16.msra.mxu1 %v3604_v21  ;;  %v3786_v18 = vld [vmem:[%s5321_s5] ss:$8 sps:$4 sm:$0xff]  }
 0x690   : > { %v3598_v19 = vpack.c.bf16 %v1967_v34, %v1963_v30  ;;  %v1948_v46 = vpop.permute.xlu1 %1947  ;;  %v1969_v42 = vmul.f32 %v1958_v16, %v5426_v54  ;;  %v1970_v6 = vmul.f32 %v1956_v26, %v5427_v33  ;;  %v5437_v26 = vpack.c.bf16 %v5435_v11, %v5436_v10  ;;  %v419_v11 = vld [vmem:[%s5323_s7 + $0x8] sm:$0xff] }
 0x691   : > { %v1955_v25 = vsel %vm537_vm6, %v1948_v46, %v1952_v48  ;;  %v1957_v40 = vsel %vm537_vm6, %v4900_v3, %v1948_v46  ;;  %v5434_v48 = vld [vmem:[#allocation33_spill] sm:$0xff]  ;;  %v423_v10 = vld [vmem:[%s5324_s8 + $0x8] sm:$0xff] }
 0x692   : > { %v1965_v5 = vmul.f32 %v1957_v40, %v5426_v54  ;;  %v1966_v28 = vmul.f32 %v1955_v25, %v5427_v33  ;;  %2638 = vmatpush1.bf16.msra.mxu0 %v3598_v19  ;;  %v1894_v15 = vpop.permute.xlu0 %1893  ;;  %v5438_v46 = vld [vmem:[#allocation25_spill] sm:$0xff] }
 0x693   : > { %v1902_v57 = vsel %vm460_vm7, %v1894_v15, %v5423_v38  ;;  %2639 = vmatprep.subr.bf16.mxu0 %v3595_v36 }
 0x694   : > { %v3600_v17 = vpack.c.bf16 %v1969_v42, %v1965_v5  ;;  %v1892_v1 = vpop.permute.xlu1 %1891  ;;  %v3601_v23 = vpack.c.bf16 %v1970_v6, %v1966_v28  ;;  %v1907_v63 = vmul.f32 %v1902_v57, %v5428_v55 }
 0x695   : > { %v1901_v3 = vsel %vm460_vm7, %v1892_v1, %v5419_v35 }
 0x696   : > { %v1903_v37 = vmul.f32 %v1901_v3, %v5428_v55  ;;  %2680 = vmatprep.subr.bf16.mxu1 %v3601_v23  ;;  %v1890_v47 = vpop.permute.xlu0 %1889 }
 0x697   : > { %v1896_v24 = vsel %vm460_vm7, %v1890_v47, %v1894_v15  ;;  %v1898_v61 = vsel %vm460_vm7, %v5422_v44, %v1890_v47  ;;  %2681 = vmatpush1.bf16.msra.mxu1 %v3600_v17 }
 0x698   : > { %v3594_v62 = vpack.c.bf16 %v1907_v63, %v1903_v37  ;;  %v1888_v39 = vpop.permute.xlu1 %1887  ;;  %v1909_v50 = vmul.f32 %v1898_v61, %v5429_v53  ;;  %v1910_v20 = vmul.f32 %v1896_v24, %v5430_v45 }
 0x699   : > { %v1895_v51 = vsel %vm460_vm7, %v1888_v39, %v1892_v1  ;;  %v1897_v56 = vsel %vm460_vm7, %v5418_v14, %v1888_v39 }
 0x69a   : > { %v1905_v2 = vmul.f32 %v1897_v56, %v5429_v53  ;;  %v1906_v41 = vmul.f32 %v1895_v51, %v5430_v45  ;;  %2640 = vmatpush1.bf16.msra.mxu0 %v3594_v62  ;;  %v2338_v35 = vpop.permute.xlu0 %2337  ;;  %v5190_v53 = vld [vmem:[%s5325_s9 + $0x8] sm:$0xff]  ;;  %v3807_v45 = vld [vmem:[%s5325_s9] sm:$0xff] }
 0x69b   : > { %v2346_v31 = vsel %vm1027_vm8, %v5431_v22, %v2338_v35 }
 0x69c   : > { %v3596_v32 = vpack.c.bf16 %v1909_v50, %v1905_v2  ;;  %v2336_v27 = vpop.permute.xlu1 %2335  ;;  %v3597_v13 = vpack.c.bf16 %v1910_v20, %v1906_v41  ;;  %v2356_v4 = vmul.f32 %v3803_v52, %v2346_v31 }
 0x69d   : > { %v2345_v14 = vsel %vm1027_vm8, %v5432_v58, %v2336_v27 }
 0x69e   : > { %v2352_v0 = vmul.f32 %v3803_v52, %v2345_v14  ;;  %2682 = vmatprep.subr.bf16.mxu1 %v3597_v13  ;;  %v2342_v43 = vpop.permute.xlu0 %2341 }
 0x69f   : > { %v2344_v29 = vsel %vm1027_vm8, %v2338_v35, %v2342_v43  ;;  %v2350_v44 = vsel %vm1027_vm8, %v2342_v43, %v5433_v8  ;;  %2683 = vmatpush1.bf16.msra.mxu1 %v3596_v32 }
 0x6a0   : > { %v2340_v38 = vpop.permute.xlu1 %2339  ;;  %v3627_v12 = vpack.c.bf16 %v2356_v4, %v2352_v0  ;;  %v2357_v49 = vmul.f32 %v3804_v60, %v2344_v29  ;;  %v2358_v7 = vmul.f32 %v3805_v9, %v2350_v44 }
 0x6a1   : > { %v2343_v21 = vsel %vm1027_vm8, %v2336_v27, %v2340_v38  ;;  %v2349_v59 = vsel %vm1027_vm8, %v2340_v38, %v5434_v48 }
 0x6a2   : > { %v2353_v34 = vmul.f32 %v3804_v60, %v2343_v21  ;;  %v2354_v30 = vmul.f32 %v3805_v9, %v2349_v59  ;;  %2655 = vmatprep.subr.bf16.mxu0 %v3627_v12 }
 0x6a3   : > { %2656 = vmatpush2.bf16.msra.mxu0 %v5437_v26 }
 0x6a4   : > { %v3628_v16 = vpack.c.bf16 %v2357_v49, %v2353_v34  ;;  %v3629_v19 = vpack.c.bf16 %v2358_v7, %v2354_v30  ;;  %v418_v30 = vld [vmem:[%s5323_s7] sm:$0xff] }
 0x6a6   : > { %2658 = vmatmul.mubr.bf16.vlgmr.msra.gmra.mxu0 %v3786_v18  ;;  %2698 = vmatprep.subr.bf16.mxu1 %v3629_v19 }
 0x6a7   : > { %2699 = vmatpush2.bf16.msra.mxu1 %v3628_v16  ;;  %3694 = vmatprep.mubr.msk.f32.mxu0 %vm1323_vm0, %v5438_v46 }
 0x6aa   : > { %2701 = vmatmul.mubr.bf16.vlgmr.msra.gmra.mxu1 %v3786_v18  ;;  %v422_v18 = vld [vmem:[%s5324_s8] sm:$0xff] }
 0x6ab   : > { %3701 = vmatprep.mubr.msk.f32.mxu1 %vm1323_vm0, %v5438_v46  ;;  %v2426_v40 = vpop.permute.xlu0 %2425 }
 0x6ad   : > { %v2431_v5 = vpop.permute.xlu1 %2430 }
 0x766   : > { %v2659_v25 = vpop.f32.mrf.mxu0 }
 0x767   : > { %v2660_v54 = vadd.f32 %v2659_v25, %v2426_v40 }
 0x768   : > { %v2661_v36 = vpop.f32.mrf.mxu0 }
 0x769   : > { %v2662_v42 = vadd.f32 %v2661_v36, %v2426_v40 }
 0x76a   : > { %v2663_v33 = vpop.f32.mrf.mxu0  ;;  %v2702_v6 = vpop.f32.mrf.mxu1 }
 0x76b   : > { %v2711_v28 = vadd.f32 %v2662_v42, %v2660_v54  ;;  %v2664_v17 = vadd.f32 %v2663_v33, %v2431_v5  ;;  %v2703_v37 = vadd.f32 %v2702_v6, %v2426_v40 }
 0x76c   : > { %v2665_v15 = vpop.f32.mrf.mxu0  ;;  %v2704_v57 = vpop.f32.mrf.mxu1 }
 0x76d   : > { %v2666_v1 = vadd.f32 %v2665_v15, %v2431_v5  ;;  %2712 = vadd.xlane.f32.xlu0 %v2711_v28  ;;  %v2705_v55 = vadd.f32 %v2704_v57, %v2426_v40 }
 0x76e   : > { %v2706_v23 = vpop.f32.mrf.mxu1 }
 0x76f   : > { %v2714_v3 = vadd.f32 %v2666_v1, %v2664_v17  ;;  %v2707_v47 = vadd.f32 %v2706_v23, %v2431_v5  ;;  %v2947_v61 = vadd.f32 %v2705_v55, %v2703_v37 }
 0x770   : > { %v2708_v63 = vpop.f32.mrf.mxu1 }
 0x771   : > { %v2709_v24 = vadd.f32 %v2708_v63, %v2431_v5  ;;  %2715 = vadd.xlane.f32.xlu1 %v2714_v3 }
 0x773   : > { %v2950_v62 = vadd.f32 %v2709_v24, %v2707_v47 }
 0x775   : > { %2948 = vadd.xlane.f32.xlu1 %v2947_v61  ;;  %2951 = vadd.xlane.f32.xlu0 %v2950_v62 }
 0x7f6   : > { %v2713_v39 = vpop.xlane.xlu0 %2712 }
 0x7fa   : > { %v2716_v51 = vpop.xlane.xlu1 %2715 }
 0x7fb   : > { %3690 = vmatprep.subr.mxu0 %v2716_v51 }
 0x7fc   : > { %3691 = vmatpush3.msra.mxu0 %v2716_v51 }
 0x7fd   : > { %3692 = vmatprep.subr.mxu0 %v2713_v39 }
 0x7fe   : > { %3693 = vmatpush3.msra.mxu0 %v2713_v39  ;;  %v2952_v56 = vpop.xlane.xlu0 %2951  ;;  %v2949_v50 = vpop.xlane.xlu1 %2948 }
 0x7ff   : > { %3695 = vmatmul.mubr.msk.f32.vlgmr.msra.gmra.mxu0 %vm1323_vm0, %v5190_v53  ;;  %3704 = vmatprep.subr.mxu0 %v2952_v56 }
 0x800   : > { %3705 = vmatpush3.msra.mxu0 %v2952_v56  ;;  %3708 = vmatprep.mubr.msk.f32.mxu0 %vm1323_vm0, %v3807_v45 }
 0x801   : > { %3706 = vmatprep.subr.mxu0 %v2949_v50 }
 0x802   : > { %3707 = vmatpush3.msra.mxu0 %v2949_v50 }
 0x803   : > { %3709 = vmatmul.mubr.msk.f32.vlgmr.msra.gmra.mxu0 %vm1323_vm0, %v5190_v53 }
 0x8bf   : > { %v3696_v20 = vpop.f32.mrf.mxu0 }
 0x8c0   : > { %2799 = vperm.xlu0 %3779, %v3696_v20  }
 0x8c1   : > { %v2783_v2 = vpop.f32.mrf.mxu0 }
 0x8c2   : > { %2794 = vperm.xlu1 %3780, %v2783_v2  }
 0x8c3   : > { %v3710_v41 = vpop.f32.mrf.mxu0 }
 0x8c5   : > { %v3019_v35 = vpop.f32.mrf.mxu0 }
 0x8c6   : > { %3035 = vperm.xlu1 %3780, %v3710_v41   ;;  %3030 = vperm.xlu0 %3779, %v3019_v35  }
 0x93b   : > { %v2800_v22 = vpop.permute.xlu0 %2799 }
 0x93c   : > { %v5200_v31 = vsub.f32 %v2664_v17, %v2800_v22  ;;  %v5202_v32 = vsub.f32 %v2666_v1, %v2800_v22 }
 0x93d   : > { %v2795_v27 = vpop.permute.xlu1 %2794 }
 0x93e   : > { %v2808_v13 = vmul.f32 %v5200_v31, %v5200_v31  ;;  %v2809_v58 = vmul.f32 %v5202_v32, %v5202_v32  ;;  %v5208_v14 = vsub.f32 %v2660_v54, %v2795_v27  ;;  %v5210_v52 = vsub.f32 %v2662_v42, %v2795_v27 }
 0x940   : > { %v2806_v4 = vmul.f32 %v5208_v14, %v5208_v14  ;;  %v2807_v0 = vmul.f32 %v5210_v52, %v5210_v52  ;;  %v2813_v43 = vadd.f32 %v2809_v58, %v2808_v13 }
 0x941   : > { %v3036_v29 = vpop.permute.xlu1 %3035  ;;  %v3031_v8 = vpop.permute.xlu0 %3030 }
 0x942   : > { %v5216_v44 = vsub.f32 %v2707_v47, %v3036_v29  ;;  %v5218_v38 = vsub.f32 %v2709_v24, %v3036_v29  ;;  %v5220_v12 = vsub.f32 %v2703_v37, %v3031_v8  ;;  %v5222_v21 = vsub.f32 %v2705_v55, %v3031_v8  ;;  %2814 = vadd.xlane.f32.xlu1 %v2813_v43  ;;  %v3163_v43 = vld [vmem:[%s4084_s12] sm:$0xff]  ;;  %v3164_v29 = vld [vmem:[%s4084_s12 + $0x8] sm:$0xff] }
 0x943   : > { %v2810_v48 = vadd.f32 %v2807_v0, %v2806_v4 }
 0x944   : > { %v3044_v59 = vmul.f32 %v5216_v44, %v5216_v44  ;;  %v3045_v60 = vmul.f32 %v5218_v38, %v5218_v38  ;;  %v3042_v49 = vmul.f32 %v5220_v12, %v5220_v12  ;;  %v3043_v9 = vmul.f32 %v5222_v21, %v5222_v21 }
 0x945   : > { %2811 = vadd.xlane.f32.xlu0 %v2810_v48 }
 0x946   : > { %v3049_v7 = vadd.f32 %v3045_v60, %v3044_v59  ;;  %v3046_v34 = vadd.f32 %v3043_v9, %v3042_v49 }
 0x948   : > { %3047 = vadd.xlane.f32.xlu1 %v3046_v34 }
 0x949   : > { %3050 = vadd.xlane.f32.xlu0 %v3049_v7 }
 0x959   : > { %2909 = vperm.xlu1 %3780, %v418_v30  }
 0x95d   : > { %2923 = vperm.xlu1 %3780, %v422_v18  }
 0x95f   : > { %2914 = vperm.xlu0 %3779, %v419_v11  }
 0x963   : > { %2928 = vperm.xlu0 %3779, %v423_v10  }
 0x9cb   : > { %v2815_v26 = vpop.xlane.xlu1 %2814 }
 0x9cc   : > { %3697 = vmatprep.subr.mxu1 %v2815_v26 }
 0x9cd   : > { %3698 = vmatpush3.msra.mxu1 %v2815_v26 }
 0x9ce   : > { %v2812_v16 = vpop.xlane.xlu0 %2811 }
 0x9cf   : > { %3699 = vmatprep.subr.mxu1 %v2812_v16 }
 0x9d0   : > { %3700 = vmatpush3.msra.mxu1 %v2812_v16 }
 0x9d1   : > { %3702 = vmatmul.mubr.msk.f32.vlgmr.msra.gmra.mxu1 %vm1323_vm0, %v5190_v53  ;;  %v3048_v46 = vpop.xlane.xlu1 %3047 }
 0x9d2   : > { %v3051_v19 = vpop.xlane.xlu0 %3050  ;;  %3715 = vmatprep.mubr.msk.f32.mxu1 %vm1323_vm0, %v3807_v45 }
 0x9d3   : > { %3711 = vmatprep.subr.mxu1 %v3051_v19 }
 0x9d4   : > { %3712 = vmatpush3.msra.mxu1 %v3051_v19 }
 0x9d5   : > { %3713 = vmatprep.subr.mxu1 %v3048_v46  ;;  %v2910_v1 = vpop.permute.xlu1 %2909 }
 0x9d6   : > { %3714 = vmatpush3.msra.mxu1 %v3048_v46 }
 0x9d7   : > { %3716 = vmatmul.mubr.msk.f32.vlgmr.msra.gmra.mxu1 %vm1323_vm0, %v5190_v53 }
 0x9d9   : > { %v2924_v3 = vpop.permute.xlu1 %2923 }
 0x9da   : > { %v2915_v23 = vpop.permute.xlu0 %2914 }
 0x9de   : > { %v2929_v55 = vpop.permute.xlu0 %2928 }
 0xa91   : > { %v3703_v25 = vpop.f32.mrf.mxu1 }
 0xa92   : > { %v2888_v40 = vadd.f32 1e-05, %v3703_v25 }
 0xa93   : > { %v2882_v36 = vpop.f32.mrf.mxu1 }
 0xa94   : > { %3795 = vrsqrt.f32 %v2888_v40  ;;  %v2883_v54 = vadd.f32 1e-05, %v2882_v36 }
 0xa96   : > { %3797 = vrsqrt.f32 %v2883_v54 }
 0xa97   : > { %v3717_v42 = vpop.f32.mrf.mxu1 }
 0xa98   : > { %v3124_v33 = vadd.f32 1e-05, %v3717_v42  ;;  %v3169_v42 = vld [vmem:[%s4084_s12 + $0x30] sm:$0xff] }
 0xa99   : > { %v3118_v6 = vpop.f32.mrf.mxu1 }
 0xa9a   : > { %3799 = vrsqrt.f32 %v3124_v33  ;;  %v3119_v5 = vadd.f32 1e-05, %v3118_v6  ;;  %v3170_v33 = vld [vmem:[%s4084_s12 + $0x38] sm:$0xff] }
 0xa9c   : > { %3801 = vrsqrt.f32 %v3119_v5 }
 0xaa1   : > { %v3796_v28 = vpop.eup %3795 }
 0xaa2   : > { %2900 = vperm.xlu1 %3780, %v3796_v28  }
 0xaa3   : > { %v3798_v15 = vpop.eup %3797 }
 0xaa4   : > { %2895 = vperm.xlu0 %3779, %v3798_v15  }
 0xaa7   : > { %v3800_v57 = vpop.eup %3799 }
 0xaa8   : > { %3136 = vperm.xlu0 %3779, %v3800_v57  }
 0xaa9   : > { %v3802_v17 = vpop.eup %3801 }
 0xaaa   : > { %3131 = vperm.xlu1 %3780, %v3802_v17  }
 0xb1d   : > { %v2901_v63 = vpop.permute.xlu1 %2900 }
 0xb1e   : > { %v2905_v37 = vmul.f32 %v2901_v63, %v5200_v31  ;;  %v2906_v47 = vmul.f32 %v2901_v63, %v5202_v32  ;;  %v3167_v31 = vld [vmem:[%s4084_s12 + $0x20] sm:$0xff]  ;;  %v3168_v32 = vld [vmem:[%s4084_s12 + $0x28] sm:$0xff] }
 0xb1f   : > { %v2896_v24 = vpop.permute.xlu0 %2895 }
 0xb20   : > { %v2919_v61 = vmul.f32 %v2915_v23, %v2905_v37  ;;  %v2920_v62 = vmul.f32 %v2915_v23, %v2906_v47  ;;  %v2903_v39 = vmul.f32 %v2896_v24, %v5208_v14  ;;  %v2904_v51 = vmul.f32 %v2896_v24, %v5210_v52 }
 0xb22   : > { %v2933_v56 = vadd.f32 %v2929_v55, %v2919_v61  ;;  %v2934_v53 = vadd.f32 %v2929_v55, %v2920_v62  ;;  %v2917_v50 = vmul.f32 %v2910_v1, %v2903_v39  ;;  %v2918_v45 = vmul.f32 %v2910_v1, %v2904_v51 }
 0xb23   : > { %v3137_v20 = vpop.permute.xlu0 %3136 }
 0xb24   : > { %v2937_v2 = vmul.f32 0.1, %v2933_v56  ;;  %v2938_v41 = vmul.f32 0.1, %v2934_v53  ;;  %v2931_v35 = vadd.f32 %v2924_v3, %v2917_v50  ;;  %v2932_v22 = vadd.f32 %v2924_v3, %v2918_v45 }
 0xb25   : > { %v3141_v27 = vmul.f32 %v3137_v20, %v5216_v44  ;;  %v3142_v13 = vmul.f32 %v3137_v20, %v5218_v38  ;;  %v3132_v58 = vpop.permute.xlu1 %3131 }
 0xb26   : > { %v2941_v14 = vmax.f32 %v2933_v56, %v2937_v2  ;;  %v2942_v52 = vmax.f32 %v2934_v53, %v2938_v41  ;;  %v2935_v4 = vmul.f32 0.1, %v2931_v35  ;;  %v2936_v0 = vmul.f32 0.1, %v2932_v22 }
 0xb27   : > { %v3145_v8 = vmul.f32 %v3141_v27, %v2915_v23  ;;  %v3146_v48 = vmul.f32 %v3142_v13, %v2915_v23  ;;  %v3139_v59 = vmul.f32 %v3132_v58, %v5220_v12  ;;  %v3140_v60 = vmul.f32 %v3132_v58, %v5222_v21  ;;  %v3166_v23 = vld [vmem:[%s4084_s12 + $0x18] sm:$0xff] }
 0xb28   : > { %v3183_v49 = vadd.f32 %v3167_v31, %v2941_v14  ;;  %v3184_v9 = vadd.f32 %v3168_v32, %v2942_v52  ;;  %v2939_v7 = vmax.f32 %v2931_v35, %v2935_v4  ;;  %v2940_v34 = vmax.f32 %v2932_v22, %v2936_v0 }
 0xb29   : > { %v3149_v44 = vadd.f32 %v3145_v8, %v2929_v55  ;;  %v3150_v38 = vadd.f32 %v3146_v48, %v2929_v55  ;;  %v3143_v30 = vmul.f32 %v3139_v59, %v2910_v1  ;;  %v3144_v18 = vmul.f32 %v3140_v60, %v2910_v1  ;;  %v3165_v1 = vld [vmem:[%s4084_s12 + $0x10] sm:$0xff] }
 0xb2a   : > { %v3191_v11 = vmul.f32 0.1, %v3183_v49  ;;  %v3192_v10 = vmul.f32 0.1, %v3184_v9  ;;  %v3179_v26 = vadd.f32 %v3163_v43, %v2939_v7  ;;  %v3180_v16 = vadd.f32 %v3164_v29, %v2940_v34 }
 0xb2b   : > { %v3153_v19 = vmul.f32 0.1, %v3149_v44  ;;  %v3154_v46 = vmul.f32 0.1, %v3150_v38  ;;  %v3147_v12 = vadd.f32 %v3143_v30, %v2924_v3  ;;  %v3148_v25 = vadd.f32 %v3144_v18, %v2924_v3 }
 0xb2c   : > { %v3199_v21 = vmax.f32 %v3183_v49, %v3191_v11  ;;  %v3200_v40 = vmax.f32 %v3184_v9, %v3192_v10  ;;  %v3187_v36 = vmul.f32 0.1, %v3179_v26  ;;  %v3188_v54 = vmul.f32 0.1, %v3180_v16 }
 0xb2d   : > { %v3157_v6 = vmax.f32 %v3149_v44, %v3153_v19  ;;  %v3158_v5 = vmax.f32 %v3150_v38, %v3154_v46  ;;  %v3151_v28 = vmul.f32 0.1, %v3147_v12  ;;  %v3152_v15 = vmul.f32 0.1, %v3148_v25 }
 0xb2e   : > { %3207 = vst [vmem:[%s404_s24 + $0x20] sm:$0xff] %v3199_v21  ;;  %3208 = vst [vmem:[%s404_s24 + $0x28] sm:$0xff] %v3200_v40  ;;  %v3195_v57 = vmax.f32 %v3179_v26, %v3187_v36  ;;  %v3196_v17 = vmax.f32 %v3180_v16, %v3188_v54 }
 0xb2f   : > { %v3185_v3 = vadd.f32 %v3169_v42, %v3157_v6  ;;  %v3186_v55 = vadd.f32 %v3170_v33, %v3158_v5  ;;  %v3155_v63 = vmax.f32 %v3147_v12, %v3151_v28  ;;  %v3156_v37 = vmax.f32 %v3148_v25, %v3152_v15 }
 0xb30   : > { %3203 = vst [vmem:[%s404_s24] sm:$0xff] %v3195_v57  ;;  %3204 = vst [vmem:[%s404_s24 + $0x8] sm:$0xff] %v3196_v17 }
 0xb31   : > { %v3193_v47 = vmul.f32 0.1, %v3185_v3  ;;  %v3194_v24 = vmul.f32 0.1, %v3186_v55  ;;  %v3181_v61 = vadd.f32 %v3165_v1, %v3155_v63  ;;  %v3182_v62 = vadd.f32 %v3166_v23, %v3156_v37 }
 0xb33   : > { %v3201_v39 = vmax.f32 %v3185_v3, %v3193_v47  ;;  %v3202_v51 = vmax.f32 %v3186_v55, %v3194_v24  ;;  %v3189_v56 = vmul.f32 0.1, %v3181_v61  ;;  %v3190_v53 = vmul.f32 0.1, %v3182_v62 }
 0xb35   : > { %3209 = vst [vmem:[%s404_s24 + $0x30] sm:$0xff] %v3201_v39  ;;  %3210 = vst [vmem:[%s404_s24 + $0x38] sm:$0xff] %v3202_v51  ;;  %v3197_v50 = vmax.f32 %v3181_v61, %v3189_v56  ;;  %v3198_v45 = vmax.f32 %v3182_v62, %v3190_v53 }
 0xb37   : > { %3205 = vst [vmem:[%s404_s24 + $0x10] sm:$0xff] %v3197_v50  ;;  %3206 = vst [vmem:[%s404_s24 + $0x18] sm:$0xff] %v3198_v45 }
 0xb38   : > { %3849 = shalt.err (!%p3846_p10)
}
 0xb39   : > { %s3850_s19 = scalar_lea.hbm %s5271_s23, 1024  ;;  %s3854_s24 = scalar_lea.hbm %s5327_s11, 2048 }
 0xb3a   : > { %p3851_p1 = scmp.ne.s32.totalorder %s5271_s23, %s3850_s19  ;;  %p3855_p0 = scmp.lt.s32.totalorder %s5271_s23, %s5327_s11 }
 0xb3b   : > { %p3856_p2 = scmp.lt.s32.totalorder %s3854_s24, %s3850_s19 }
 0xb3c   : > { %p3852_p3 = pnand %p3851_p1, %p5440_p12 }
 0xb3d   : > { %p3857_p6 = por %p3856_p2, %p3855_p0 }
 0xb3e   : > { %p3853_p9 = pneg %p3852_p3 }
 0xb40   : > { %p3858_p11 = pnand %p3857_p6, %p3853_p9 }
 0xb42   : > { %3861 = shalt.err (!%p3858_p11)
}
 0xb43   : > { %s3916_s12 = smov 512   ;;  %s3917_s25 = smov 1024  }
 0xb44   : > { %s3918_s22 = smov 32  }
 0xb45   : > { %3720 = dma.vmem_to_hbm [thread:$0]  (%p5440_p12), %s5273_s16, 1024, %s5271_s23, %s3212_s21, %s3916_s12, %s3917_s25, %s3918_s22  }
 0xb46 PF: > { %s5441_s15 = sld [smem:[#allocation13_spill]]  ;;  %s3240_s14 = sand.u32 1, %s3888_s17  }
 0xb47   : > { %p5443_p4 = scmp.ge.s32.totalorder %s3900_s20, 2  ;;  %s3241_s19 = scalar_lea.sflag [#allocation6], %s3240_s14 }
 0xb4c   : > { %p5442_p13 = scmp.ne.s32.totalorder %s5441_s15, 0 }
 0xb4e   : > { %p3727_p5 = pnand %p5443_p4, %p5442_p13 }
 0xb50   : > { %p3728_p7 = pneg %p3727_p5 }
 0xb52   : > { %3883 = dma.done.wait (%p3728_p7), %s3241_s19, 1024  }
 0xb53   : > { %3885 = vsyncadd (%p3728_p7), %s3241_s19, 4294966272  ;;  %s5444_s20 = sld [smem:[#allocation11_spill]]  ;;  %s5447_s17 = smov %s3892_s18 }
 0xb54   : > { %s5445_s26 = sld [smem:[#allocation10_spill]] }
 0xb55   : > { %s5446_s19 = sld [smem:[#allocation12_spill]] }
 0xb59   : > { %p24_p8 = scmp.ge.s32.totalorder %s5444_s20, 4  }
 0xb5a   : > { %s5448_s18 = smov %s5445_s26 }
 0xb5b   :  { %26 = sbr.rel (!%p24_p8) target bundleno = 5 (0x5), region = 109 }
 0xb60   :  { %3246 = vsyncpa [#allocation5], 1 }
 0xb61   :  { %3248 = vsyncpa [#allocation5 + $0x1], 1 }
 0xb62   :  { %3249 = vsyncpa [#allocation6], 1 }
 0xb63   :  { %3251 = vsyncpa [#allocation6 + $0x1], 1 }

</bundles_post_ra>
